<compile_context>
chip_gen: v6e
topology: v6e:2x2x1
jax: 0.10.0
libtpu: 0.0.40
codegen_flags: <defaults>
</compile_context>

<pallas_src>
import jax
import jax.numpy as jnp
from jax.experimental import pallas as pl
from jax.experimental.pallas import tpu as pltpu


def _round_up(x, m):
    return pl.cdiv(x, m) * m


def _make_kernel(l_valid, compute_dtype):
    def kernel(q_ref, qpb_ref, k_ref, v_ref, wk_ref, ws_ref, ctx_ref, attn_ref):
        bt, lp, dp = k_ref.shape
        f32 = jnp.float32

        # Key projection: one fused (BT*Lp, Dp) @ (Dp, Dp) MXU matmul,
        # bf16 feeds / f32 accumulation.
        k2 = k_ref[...].reshape(bt * lp, dp)
        k_proj = jnp.dot(k2, wk_ref[...], preferred_element_type=f32)      # (BT*Lp, Dp) f32

        # tanh(key_proj + (query_proj + bias)); the query projection (+ bias)
        # is hoisted to the wrapper. tanh runs in the compute dtype so the
        # EUP processes packed bf16 vregs on v6e/v7x.
        pre = k_proj.reshape(bt, lp, dp) + qpb_ref[...][:, None, :]        # f32
        h = jnp.tanh(pre.astype(compute_dtype))                            # (BT, Lp, Dp)

        # score_proj: contraction with ws over the lane (Dp) axis -> lane-major (BT, Lp).
        # TODO(synk): the MXU-matvec form ((BT*Lp,Dp)@(Dp,1)) needs a cross-lane
        # relayout of its (BT*Lp,1) result back to (BT,Lp); kept the VPU-mult +
        # XLU-reduce since the tanh EUP slot above is the binding one here.
        score = jnp.sum((h * ws_ref[...]).astype(f32), axis=-1)            # (BT, Lp) f32
        # score_proj bias is dropped: a scalar shift is a no-op under softmax.

        if lp != l_valid:  # mask padded key positions (static at trace time)
            lane = jax.lax.broadcasted_iota(jnp.int32, score.shape, 1)
            score = jnp.where(lane < l_valid, score, jnp.float32(-1e30))

        # Softmax over the key axis; exact reciprocal on a (BT, 1) tensor.
        m = jnp.max(score, axis=-1, keepdims=True)
        e = jnp.exp(score - m)
        attn = e * pl.reciprocal(jnp.sum(e, axis=-1, keepdims=True), approx=False)

        # context = attn @ value (+ query residual), batched over BT on the MXU.
        ctx = jnp.einsum("bql,bld->bqd",
                         attn[:, None, :].astype(compute_dtype), v_ref[...],
                         preferred_element_type=f32)[:, 0, :]              # (BT, Dp) f32

        ctx_ref[...] = (ctx + q_ref[...]).astype(ctx_ref.dtype)
        attn_ref[...] = attn.astype(attn_ref.dtype)

    return kernel


def additive_attention(query, key, value, Wq, Wk, Ws, bs, bias, *,
                       b_tile=None, compute_dtype=jnp.bfloat16):
    """Pallas forward of AdditiveAttention.

    Wq, Wk: (D, D) nn.Linear weights (out, in); Ws: (1, D); bs: scalar; bias: (D,).
    bs is accepted for parity with the module but unused: adding a scalar to every
    score is a no-op under softmax, so context/attn are unchanged without it.
    """
    del bs
    f32 = jnp.float32
    B, QL, D = query.shape
    _, L, _ = key.shape
    assert QL == 1, "q_len must be 1 (Bahdanau decoder step)"

    LANE = 128
    Dp = _round_up(D, LANE)      # lane-dense model dim
    Lp = _round_up(L, LANE)      # lane-dense attn output; padded keys masked to -inf
    cbytes = jnp.dtype(compute_dtype).itemsize

    # --- batch tile: ~2 MiB K/V blocks, multiple of 8, >= 2 grid steps when B allows.
    if b_tile is None:
        per_row = Lp * Dp * cbytes
        b_tile = max(8, min(256, ((2 << 20) // max(per_row, 1)) // 8 * 8))
        b_tile = min(b_tile, _round_up(B, 8))
        if B > 8:  # at least 2 parallel grid steps so both v7x TensorCores get work
            b_tile = min(b_tile, _round_up(pl.cdiv(B, 2), 8))
    b_tile = max(8, _round_up(b_tile, 8))
    n_tiles = pl.cdiv(B, b_tile)
    Bp = n_tiles * b_tile

    # --- zero-padded f32 operands (zero pads keep the math exact; padded key
    #     positions are additionally masked to -inf inside the kernel).
    q2 = jnp.pad(query.reshape(B, D).astype(f32), ((0, Bp - B), (0, Dp - D)))
    k3 = jnp.pad(key.astype(f32), ((0, Bp - B), (0, Lp - L), (0, Dp - D)))
    v3 = jnp.pad(value.astype(f32), ((0, Bp - B), (0, Lp - L), (0, Dp - D)))
    wq_p = jnp.pad(Wq.T.astype(f32), ((0, Dp - D), (0, Dp - D)))
    wk_p = jnp.pad(Wk.T.astype(f32), ((0, Dp - D), (0, Dp - D)))
    ws_p = jnp.pad(Ws.reshape(1, D).astype(f32), ((0, 0), (0, Dp - D)))
    bias_p = jnp.pad(bias.reshape(1, D).astype(f32), ((0, 0), (0, Dp - D)))

    # Query projection + additive bias hoisted out of the kernel (L x smaller than
    # the key projection; also drops Wq^T from the kernel's VMEM footprint).
    qpb = q2 @ wq_p + bias_p                                              # (Bp, Dp) f32

    # bf16 MXU feeds; accumulation stays f32 inside the kernel.
    k_c, v_c = k3.astype(compute_dtype), v3.astype(compute_dtype)
    wk_c, ws_c = wk_p.astype(compute_dtype), ws_p.astype(compute_dtype)

    # --- explicit VMEM budget (v5e scoped default is only 16 MiB; v7x physical 64 MiB).
    kv_block = b_tile * Lp * Dp * cbytes
    est = (2 * 2 * kv_block                               # K, V blocks (double-buffered)
           + 2 * 2 * b_tile * Dp * 4                      # q residual + projected q
           + 2 * (Dp * Dp + Dp) * cbytes                  # Wk^T, ws blocks
           + 2 * b_tile * (Dp + Lp) * 4                   # ctx / attn output blocks
           + 4 * b_tile * Lp * Dp * 4)                    # f32 k_proj / pre / h temporaries
    vmem_limit = int(min(2 * est + (8 << 20), 56 << 20))

    kernel = _make_kernel(L, compute_dtype)
    ctx_p, attn_p = pl.pallas_call(
        kernel,
        out_shape=(jax.ShapeDtypeStruct((Bp, Dp), f32),    # context (lane-dense)
                   jax.ShapeDtypeStruct((Bp, Lp), f32)),   # attention weights (lane-dense)
        grid_spec=pltpu.PrefetchScalarGridSpec(
            num_scalar_prefetch=0,
            grid=(n_tiles,),
            in_specs=[
                pl.BlockSpec((b_tile, Dp), lambda i: (i, 0)),          # query (residual)
                pl.BlockSpec((b_tile, Dp), lambda i: (i, 0)),          # query_proj + bias
                pl.BlockSpec((b_tile, Lp, Dp), lambda i: (i, 0, 0)),   # key
                pl.BlockSpec((b_tile, Lp, Dp), lambda i: (i, 0, 0)),   # value
                pl.BlockSpec((Dp, Dp), lambda i: (0, 0)),              # Wk^T
                pl.BlockSpec((1, Dp), lambda i: (0, 0)),               # score_proj weight
            ],
            out_specs=[
                pl.BlockSpec((b_tile, Dp), lambda i: (i, 0)),          # context
                pl.BlockSpec((b_tile, Lp), lambda i: (i, 0)),          # attn
            ],
        ),
        compiler_params=pltpu.CompilerParams(
            dimension_semantics=("parallel",),
            vmem_limit_bytes=vmem_limit),
    )(q2, qpb, k_c, v_c, wk_c, ws_c)

    ctx = ctx_p[:B, :D].reshape(B, 1, D).astype(query.dtype)
    attn = attn_p[:B, :L]                       # (B, L), matches torch squeeze(-1)
    return ctx, attn


def reference(query, key, value, Wq, Wk, Ws, bs, bias):
    """Pure-JAX reference mirroring the PyTorch forward."""
    qp = query @ Wq.T
    kp = key @ Wk.T
    h = jnp.tanh(kp + qp + bias)
    score = (h @ Ws.T)[..., 0] + bs                         # (B, L)
    attn = jax.nn.softmax(score, axis=-1)
    ctx = jnp.einsum("bl,bld->bd", attn, value)[:, None, :] + query
    return ctx, attn


if __name__ == "__main__":
    B, L, D = 2, 10, 32   # batch, key/value length, model dim (q_len = 1)

    root = jax.random.PRNGKey(0)
    ks = jax.random.split(root, 8)

    query = jax.random.normal(ks[0], (B, 1, D), jnp.float32)
    key_t = jax.random.normal(ks[1], (B, L, D), jnp.float32)
    value = jax.random.normal(ks[2], (B, L, D), jnp.float32)

    # Deterministic parameter init (shapes from the module's __init__).
    Wq = jax.random.uniform(ks[3], (D, D), jnp.float32, -0.1, 0.1)    # query_proj.weight (no bias)
    Wk = jax.random.uniform(ks[4], (D, D), jnp.float32, -0.1, 0.1)    # key_proj.weight (no bias)
    Ws = jax.random.uniform(ks[5], (1, D), jnp.float32, -0.1, 0.1)    # score_proj.weight
    bs = jax.random.uniform(ks[6], (), jnp.float32, -0.1, 0.1)        # score_proj.bias
    bias = jax.random.uniform(ks[7], (D,), jnp.float32, -0.1, 0.1)    # self.bias

    # TODO(synk): block_mask is stored in __init__ but never used in forward; omitted.

    ctx, attn = additive_attention(query, key_t, value, Wq, Wk, Ws, bs, bias)
    jax.block_until_ready((ctx, attn))

    ctx_ref, attn_ref = reference(query, key_t, value, Wq, Wk, Ws, bs, bias)
    assert ctx.shape == (B, 1, D) and attn.shape == (B, L)
    # 2e-2 tolerance: the key/value/score matmuls feed the MXU in bfloat16
    # (f32 accumulation). Attention rows still sum to 1 (exact reciprocal);
    # pass compute_dtype=jnp.float32 for near-exact numerics.
    assert jnp.allclose(ctx, ctx_ref, rtol=2e-2, atol=2e-2), "context mismatch"
    assert jnp.allclose(attn, attn_ref, rtol=2e-2, atol=2e-2), "attn mismatch"

    print("KERNEL_OK")
</pallas_src>

<mosaic_0001>
module attributes {stable_mosaic.version = 11 : i64} {
  func.func @kernel(%arg0: i32, %arg1: memref<8x128xf32, #tpu.memory_space<vmem>>, %arg2: memref<8x128xf32, #tpu.memory_space<vmem>>, %arg3: memref<8x128x128xbf16, #tpu.memory_space<vmem>>, %arg4: memref<8x128x128xbf16, #tpu.memory_space<vmem>>, %arg5: memref<128x128xbf16, #tpu.memory_space<vmem>>, %arg6: memref<1x128xbf16, #tpu.memory_space<vmem>>, %arg7: memref<8x128xf32, #tpu.memory_space<vmem>>, %arg8: memref<8x128xf32, #tpu.memory_space<vmem>>) attributes {dimension_semantics = [#tpu.dimension_semantics<parallel>], iteration_bounds = array<i64: 1>, scalar_prefetch = 0 : i64, scratch_operands = 0 : i64, tpu.core_type = #tpu.core_type<tc>, window_params = [{transform_indices = @transform_0, window_bounds = array<i64: 8, 128>}, {transform_indices = @transform_1, window_bounds = array<i64: 8, 128>}, {transform_indices = @transform_2, window_bounds = array<i64: 8, 128, 128>}, {transform_indices = @transform_3, window_bounds = array<i64: 8, 128, 128>}, {pipeline_mode = #tpu.pipeline_mode<synchronous>, transform_indices = @transform_4, window_bounds = array<i64: 128, 128>}, {pipeline_mode = #tpu.pipeline_mode<synchronous>, transform_indices = @transform_5, window_bounds = array<i64: 1, 128>}, {transform_indices = @transform_6, window_bounds = array<i64: 8, 128>}, {transform_indices = @transform_7, window_bounds = array<i64: 8, 128>}]} {
    %c0 = arith.constant 0 : index
    %c0_0 = arith.constant 0 : index
    %c0_1 = arith.constant 0 : index
    %0 = vector.load %arg3[%c0, %c0_0, %c0_1] : memref<8x128x128xbf16, #tpu.memory_space<vmem>>, vector<8x128x128xbf16>
    %1 = vector.shape_cast %0 : vector<8x128x128xbf16> to vector<1024x128xbf16>
    %c0_2 = arith.constant 0 : index
    %c0_3 = arith.constant 0 : index
    %2 = vector.load %arg5[%c0_2, %c0_3] : memref<128x128xbf16, #tpu.memory_space<vmem>>, vector<128x128xbf16>
    %cst = arith.constant dense<0.000000e+00> : vector<1024x128xf32>
    %3 = tpu.matmul %1, %2, %cst {dimension_numbers = #tpu.dot_dimension_numbers<[1], [0], [0], [1], [0, 0, 1, 1], [], []>} : vector<1024x128xbf16>, vector<128x128xbf16>, vector<1024x128xf32> -> vector<1024x128xf32>
    %4 = vector.shape_cast %3 : vector<1024x128xf32> to vector<8x128x128xf32>
    %c0_4 = arith.constant 0 : index
    %c0_5 = arith.constant 0 : index
    %5 = vector.load %arg2[%c0_4, %c0_5] : memref<8x128xf32, #tpu.memory_space<vmem>>, vector<8x128xf32>
    %6 = vector.shape_cast %5 : vector<8x128xf32> to vector<8x1x128xf32>
    %7 = vector.broadcast %6 : vector<8x1x128xf32> to vector<8x128x128xf32>
    %8 = arith.addf %4, %7 : vector<8x128x128xf32>
    %9 = arith.truncf %8 : vector<8x128x128xf32> to vector<8x128x128xbf16>
    %10 = math.tanh %9 : vector<8x128x128xbf16>
    %c0_6 = arith.constant 0 : index
    %c0_7 = arith.constant 0 : index
    %11 = vector.load %arg6[%c0_6, %c0_7] : memref<1x128xbf16, #tpu.memory_space<vmem>>, vector<1x128xbf16>
    %12 = vector.shape_cast %11 : vector<1x128xbf16> to vector<1x1x128xbf16>
    %13 = vector.broadcast %12 : vector<1x1x128xbf16> to vector<8x128x128xbf16>
    %14 = arith.mulf %10, %13 : vector<8x128x128xbf16>
    %15 = arith.extf %14 : vector<8x128x128xbf16> to vector<8x128x128xf32>
    %cst_8 = arith.constant dense<0.000000e+00> : vector<8x128xf32>
    %16 = vector.multi_reduction <add>, %15, %cst_8 [2] : vector<8x128x128xf32> to vector<8x128xf32>
    %17 = tpu.iota {dimensions = array<i32: 1>} : vector<8x128xi32>
    %c10_i32 = arith.constant 10 : i32
    %18 = vector.broadcast %c10_i32 : i32 to vector<8x128xi32>
    %19 = arith.cmpi slt, %17, %18 : vector<8x128xi32>
    %cst_9 = arith.constant -1.000000e+30 : f32
    %20 = vector.broadcast %cst_9 : f32 to vector<8x128xf32>
    %21 = arith.select %19, %16, %20 : vector<8x128xi1>, vector<8x128xf32>
    %cst_10 = arith.constant dense<0xFF800000> : vector<8xf32>
    %22 = vector.multi_reduction <maximumf>, %21, %cst_10 [1] : vector<8x128xf32> to vector<8xf32>
    %23 = vector.shape_cast %22 : vector<8xf32> to vector<8x1xf32>
    %24 = vector.broadcast %23 : vector<8x1xf32> to vector<8x128xf32>
    %25 = arith.subf %21, %24 : vector<8x128xf32>
    %26 = math.exp %25 : vector<8x128xf32>
    %cst_11 = arith.constant dense<0.000000e+00> : vector<8xf32>
    %27 = vector.multi_reduction <add>, %26, %cst_11 [1] : vector<8x128xf32> to vector<8xf32>
    %28 = vector.shape_cast %27 : vector<8xf32> to vector<8x1xf32>
    %29 = tpu.reciprocal %28 : vector<8x1xf32> -> vector<8x1xf32>
    %30 = vector.broadcast %29 : vector<8x1xf32> to vector<8x128xf32>
    %31 = arith.mulf %26, %30 : vector<8x128xf32>
    %32 = vector.shape_cast %31 : vector<8x128xf32> to vector<8x1x128xf32>
    %33 = arith.truncf %32 : vector<8x1x128xf32> to vector<8x1x128xbf16>
    %c0_12 = arith.constant 0 : index
    %c0_13 = arith.constant 0 : index
    %c0_14 = arith.constant 0 : index
    %34 = vector.load %arg4[%c0_12, %c0_13, %c0_14] : memref<8x128x128xbf16, #tpu.memory_space<vmem>>, vector<8x128x128xbf16>
    "tpu.trace_start"() <{level = 10 : i32, message = "bql,bld->bqd"}> : () -> ()
    %cst_15 = arith.constant dense<0.000000e+00> : vector<8x1x128xf32>
    %35 = tpu.matmul %33, %34, %cst_15 {dimension_numbers = #tpu.dot_dimension_numbers<[2], [1], [1], [2], [0, 0, 0, 1, 1, 2], [0], [0]>} : vector<8x1x128xbf16>, vector<8x128x128xbf16>, vector<8x1x128xf32> -> vector<8x1x128xf32>
    "tpu.trace_stop"() : () -> ()
    %36 = vector.shape_cast %35 : vector<8x1x128xf32> to vector<8x128xf32>
    %c0_16 = arith.constant 0 : index
    %c0_17 = arith.constant 0 : index
    %37 = vector.load %arg1[%c0_16, %c0_17] : memref<8x128xf32, #tpu.memory_space<vmem>>, vector<8x128xf32>
    %38 = arith.addf %36, %37 : vector<8x128xf32>
    %c0_18 = arith.constant 0 : index
    %c0_19 = arith.constant 0 : index
    %39 = vector.load %arg7[%c0_18, %c0_19] : memref<8x128xf32, #tpu.memory_space<vmem>>, vector<8x128xf32>
    tpu.vector_store %arg7[%c0_18, %c0_19], %38 {strides = array<i32>} : memref<8x128xf32, #tpu.memory_space<vmem>>, vector<8x128xf32>,
    %c0_20 = arith.constant 0 : index
    %c0_21 = arith.constant 0 : index
    %40 = vector.load %arg8[%c0_20, %c0_21] : memref<8x128xf32, #tpu.memory_space<vmem>>, vector<8x128xf32>
    tpu.vector_store %arg8[%c0_20, %c0_21], %31 {strides = array<i32>} : memref<8x128xf32, #tpu.memory_space<vmem>>, vector<8x128xf32>,
    return
  }
  func.func @transform_0(%arg0: i32) -> (i32, i32) {
    %c0_i32 = arith.constant 0 : i32
    %c0_i32_0 = arith.constant 0 : i32
    return %arg0, %c0_i32 : i32, i32
  }
  func.func @transform_1(%arg0: i32) -> (i32, i32) {
    %c0_i32 = arith.constant 0 : i32
    %c0_i32_0 = arith.constant 0 : i32
    return %arg0, %c0_i32 : i32, i32
  }
  func.func @transform_2(%arg0: i32) -> (i32, i32, i32) {
    %c0_i32 = arith.constant 0 : i32
    %c0_i32_0 = arith.constant 0 : i32
    %c0_i32_1 = arith.constant 0 : i32
    return %arg0, %c0_i32, %c0_i32_0 : i32, i32, i32
  }
  func.func @transform_3(%arg0: i32) -> (i32, i32, i32) {
    %c0_i32 = arith.constant 0 : i32
    %c0_i32_0 = arith.constant 0 : i32
    %c0_i32_1 = arith.constant 0 : i32
    return %arg0, %c0_i32, %c0_i32_0 : i32, i32, i32
  }
  func.func @transform_4(%arg0: i32) -> (i32, i32) {
    %c0_i32 = arith.constant 0 : i32
    %c0_i32_0 = arith.constant 0 : i32
    %c0_i32_1 = arith.constant 0 : i32
    return %c0_i32, %c0_i32_0 : i32, i32
  }
  func.func @transform_5(%arg0: i32) -> (i32, i32) {
    %c0_i32 = arith.constant 0 : i32
    %c0_i32_0 = arith.constant 0 : i32
    %c0_i32_1 = arith.constant 0 : i32
    return %c0_i32, %c0_i32_0 : i32, i32
  }
  func.func @transform_6(%arg0: i32) -> (i32, i32) {
    %c0_i32 = arith.constant 0 : i32
    %c0_i32_0 = arith.constant 0 : i32
    return %arg0, %c0_i32 : i32, i32
  }
  func.func @transform_7(%arg0: i32) -> (i32, i32) {
    %c0_i32 = arith.constant 0 : i32
    %c0_i32_0 = arith.constant 0 : i32
    return %arg0, %c0_i32 : i32, i32
  }
}

</mosaic_0001>

<bundles_post_ra>
// kernel: tpu_custom_call.1
= control target key start
LH: loop header
LB: loop body
LE: loop exit
PB: predicated region body
PF: predicated region fallthrough
CT: control target
= control target key end

     0   :  { %13 = vsyncpa [#allocation3], 0  ;;  %s5752_s0 = inlined_call_operand.hbm [shape: f32[8,128], index: 0, kind: input, shape index: {}]   ;;  %s5753_s1 = inlined_call_operand.hbm [shape: f32[8,128], index: 1, kind: input, shape index: {}]   ;;  %s5754_s2 = inlined_call_operand.hbm [shape: bf16[8,128,128], index: 2, kind: input, shape index: {}]   ;;  %s5755_s3 = inlined_call_operand.hbm [shape: bf16[8,128,128], index: 3, kind: input, shape index: {}]   ;;  %s5756_s4 = inlined_call_operand.hbm [shape: bf16[128,128], index: 4, kind: input, shape index: {}]   ;;  %s5757_s5 = inlined_call_operand.vmem [shape: bf16[1,128], index: 5, kind: input, shape index: {}]   ;;  %s5758_s6 = inlined_call_operand.hbm [shape: f32[8,128], index: 6, kind: output, shape index: {0}]   ;;  %s5759_s7 = inlined_call_operand.hbm [shape: f32[8,128], index: 7, kind: output, shape index: {1}]  }
   0x1   :  { %14 = vsyncpa [#allocation6], 0 }
   0x2   :  { %15 = vsyncpa [#allocation9], 0 }
   0x3   :  { %16 = vsyncpa [#allocation4], 0 }
   0x4   :  { %17 = vsyncpa [#allocation13], 0  ;;  %s4828_s24 = smov [#allocation5]  }
   0x5   :  { %s34_s25 = sshll.u32 %s4828_s24, 4  ;;  %s35_s25 = int_to_ptr.vmem [resolvable:$true] %s34_s25 }
   0x6   :  { %s4686_s26 = scalar_lea.vmem %s35_s25, 128  ;;  %p4691_p1 = scmp.lt.s32.totalorder %s35_s25, %s35_s25 }
   0x7   :  { %p4687_p0 = scmp.ne.s32.totalorder %s35_s25, %s4686_s26  ;;  %p4692_p2 = scmp.lt.s32.totalorder %s4686_s26, %s4686_s26 }
   0x9   :  { %p4693_p3 = por %p4692_p2, %p4691_p1 }
   0xb   :  { %p4694_p4 = pnand %p4693_p3, %p4687_p0 }
   0xd   :  { %4697 = shalt.err (!%p4694_p4)
}
   0xe   :  { %37 = dma.hbm_to_vmem [thread:$0]  %s5753_s1, 128, %s35_s25, [#allocation6]  }
   0xf   :  { %s4829_s29 = smov [#allocation8]   ;;  %s4830_s8 = smov [#allocation2]  }
  0x10   :  { %s55_s30 = sshll.u32 %s4829_s29, 4  ;;  %s24_s9 = sshll.u32 %s4830_s8, 4  ;;  %s56_s30 = int_to_ptr.vmem [resolvable:$true] %s55_s30  ;;  %s25_s9 = int_to_ptr.vmem [resolvable:$true] %s24_s9 }
  0x11   :  { %s4706_s10 = scalar_lea.vmem %s56_s30, 8192  ;;  %p4711_p6 = scmp.lt.s32.totalorder %s56_s30, %s56_s30 }
  0x12   :  { %p4707_p5 = scmp.ne.s32.totalorder %s56_s30, %s4706_s10  ;;  %p4712_p7 = scmp.lt.s32.totalorder %s4706_s10, %s4706_s10 }
  0x14   :  { %p4713_p8 = por %p4712_p7, %p4711_p6 }
  0x16   :  { %p4714_p9 = pnand %p4713_p8, %p4707_p5 }
  0x18   :  { %4717 = shalt.err (!%p4714_p9)
}
  0x19   :  { %s4831_s11 = smov 64   ;;  %s4832_s12 = smov 4  }
  0x1a   :  { %61 = dma.hbm_to_vmem [thread:$0]  %s5755_s3, 8192, %s56_s30, [#allocation9], %s4831_s11, %s4831_s11, %s4832_s12  }
  0x1b   :  { %s4726_s1 = scalar_lea.vmem %s25_s9, 128  ;;  %p4731_p11 = scmp.lt.s32.totalorder %s25_s9, %s25_s9 }
  0x1c   :  { %p4727_p10 = scmp.ne.s32.totalorder %s25_s9, %s4726_s1  ;;  %p4732_p12 = scmp.lt.s32.totalorder %s4726_s1, %s4726_s1 }
  0x1e   :  { %p4733_p13 = por %p4732_p12, %p4731_p11 }
  0x20   :  { %p4734_p0 = pnand %p4733_p13, %p4727_p10 }
  0x22   :  { %4737 = shalt.err (!%p4734_p0)
}
  0x23   :  { %27 = dma.hbm_to_vmem [thread:$0]  %s5752_s0, 128, %s25_s9, [#allocation3]  }
  0x24   :  { %s4833_s17 = smov [#allocation7]   ;;  %s4834_s19 = smov [#allocation10]  }
  0x25   :  { %s43_s18 = sshll.u32 %s4833_s17, 4  ;;  %s67_s20 = sshll.u32 %s4834_s19, 4  ;;  %s44_s18 = int_to_ptr.vmem [resolvable:$true] %s43_s18  ;;  %s68_s20 = int_to_ptr.vmem [resolvable:$true] %s67_s20 }
  0x26   :  { %s4746_s21 = scalar_lea.vmem %s44_s18, 8192  ;;  %p4751_p2 = scmp.lt.s32.totalorder %s44_s18, %s44_s18 }
  0x27   :  { %p4747_p1 = scmp.ne.s32.totalorder %s44_s18, %s4746_s21  ;;  %p4752_p3 = scmp.lt.s32.totalorder %s4746_s21, %s4746_s21 }
  0x29   :  { %p4753_p4 = por %p4752_p3, %p4751_p2 }
  0x2b   :  { %p4754_p5 = pnand %p4753_p4, %p4747_p1 }
  0x2d   :  { %4757 = shalt.err (!%p4754_p5)
}
  0x2e   :  { %49 = dma.hbm_to_vmem [thread:$0]  %s5754_s2, 8192, %s44_s18, [#allocation6], %s4831_s11, %s4831_s11, %s4832_s12  }
  0x2f   :  { %s4766_s0 = scalar_lea.vmem %s68_s20, 1024  ;;  %p4771_p7 = scmp.lt.s32.totalorder %s68_s20, %s68_s20 }
  0x30   :  { %p4767_p6 = scmp.ne.s32.totalorder %s68_s20, %s4766_s0  ;;  %p4772_p8 = scmp.lt.s32.totalorder %s4766_s0, %s4766_s0 }
  0x32   :  { %p4773_p9 = por %p4772_p8, %p4771_p7 }
  0x34   :  { %p4774_p10 = pnand %p4773_p9, %p4767_p6 }
  0x36   :  { %4777 = shalt.err (!%p4774_p10)
}
  0x37   :  { %73 = dma.hbm_to_vmem [thread:$0]  %s5756_s4, 1024, %s68_s20, [#allocation9], %s4831_s11, %s4831_s11, %s4832_s12  }
  0x38   :  { %4818 = dma.done.wait [#allocation3], 128  }
  0x39   :  { %4819 = vsyncadd [#allocation3], 4294967168 }
  0x3a   :  { %4820 = dma.done.wait [#allocation6], 8320  }
  0x3b   :  { %4821 = vsyncadd [#allocation6], 4294958976 }
  0x3c   :  { %4822 = dma.done.wait [#allocation9], 9216  }
  0x3d   :  { %4823 = vsyncadd [#allocation9], 4294958080  ;;  %v4409_v0 = vld [vmem:[#allocation10 + $0x38] sm:$0xff]   ;;  %v4410_v1 = vld [vmem:[#allocation10 + $0x30] sm:$0xff]   ;;  %v4835_v55 = vmov 1966171168   ;;  %v1219_v57 = vlaneseq }
  0x3e   :  { %4093 = vmatprep.subr.bf16.mxu0 %v4409_v0  ;;  %v4411_v2 = vld [vmem:[#allocation10 + $0x28] sm:$0xff]   ;;  %v4412_v3 = vld [vmem:[#allocation10 + $0x20] sm:$0xff]   ;;  %v4413_v5 = vld [vmem:[#allocation10 + $0x18] sm:$0xff]   ;;  %v1217_v56 = vunpack.c.l.s4 %v4835_v55  ;;  %vm2156_vm0 = vcmask 130112   ;;  %vm2163_vm1 = vcmask 195712   ;;  %vm2170_vm2 = vcmask 261312  }
  0x3f   :  { %4094 = vmatpush3.bf16.msra.mxu0 %v4409_v0  ;;  %v4417_v4 = vld [vmem:[#allocation7] sm:$0xff]   ;;  %v4414_v6 = vld [vmem:[#allocation10 + $0x10] sm:$0xff]   ;;  %v4415_v7 = vld [vmem:[#allocation10 + $0x8] sm:$0xff]   ;;  %v4905_v59 = vshrl.u32 %v1219_v57, 7  ;;  %vm2177_vm3 = vcmask 326912   ;;  %vm2184_vm4 = vcmask 392512  }
  0x40   :  { %4095 = vmatprep.subr.bf16.mxu0 %v4410_v1  ;;  %4109 = vmatprep.mubr.bf16.mxu0 %v4417_v4  ;;  %v4416_v8 = vld [vmem:[#allocation10] sm:$0xff]   ;;  %v4418_v9 = vld [vmem:[#allocation7 + $0x8] sm:$0xff]   ;;  %v4419_v10 = vld [vmem:[#allocation7 + $0x10] sm:$0xff]   ;;  %v1218_v58 = vunpack.c.0.s8 %v1217_v56  ;;  %vm2191_vm5 = vcmask 458112   ;;  %vm2198_vm6 = vcmask 523712   ;;  %vm2205_vm7 = vcmask 589312  }
  0x41   :  { %v4420_v11 = vld [vmem:[#allocation7 + $0x18] sm:$0xff]   ;;  %v4421_v12 = vld [vmem:[#allocation7 + $0x20] sm:$0xff]   ;;  %v4422_v13 = vld [vmem:[#allocation7 + $0x28] sm:$0xff]   ;;  %vm2212_vm8 = vcmask 654912   ;;  %vm2219_vm9 = vcmask 720512   ;;  %vm2226_vm10 = vcmask 786112  }
  0x42   :  { %v4423_v14 = vld [vmem:[#allocation7 + $0x30] sm:$0xff]   ;;  %v4424_v15 = vld [vmem:[#allocation7 + $0x38] sm:$0xff]   ;;  %v4425_v16 = vld [vmem:[#allocation7 + $0x40] sm:$0xff]   ;;  %v4908_v62 = vsub.s32 %v1218_v58, %v4905_v59  ;;  %vm2233_vm11 = vcmask 851712   ;;  %vm2240_vm12 = vcmask 917312   ;;  %vm2247_vm13 = vcmask 982912  }
  0x43   :  { %4096 = vmatpush3.bf16.msra.mxu0 %v4410_v1  ;;  %v4426_v17 = vld [vmem:[#allocation7 + $0x48] sm:$0xff]   ;;  %v4427_v18 = vld [vmem:[#allocation7 + $0x50] sm:$0xff]   ;;  %v4428_v19 = vld [vmem:[#allocation7 + $0x58] sm:$0xff]   ;;  %vm2254_vm14 = vcmask 1048512   ;;  %vm5760_vm15 = vcmask 1041409  }
  0x44   :  { %4097 = vmatprep.subr.bf16.mxu0 %v4411_v2  ;;  %v4429_v20 = vld [vmem:[#allocation7 + $0x60] sm:$0xff]   ;;  %v4430_v21 = vld [vmem:[#allocation7 + $0x68] sm:$0xff]   ;;  %v4431_v22 = vld [vmem:[#allocation7 + $0x70] sm:$0xff]  }
  0x45   :  { %v4432_v23 = vld [vmem:[#allocation7 + $0x78] sm:$0xff]   ;;  %v4433_v24 = vld [vmem:[#allocation7 + $0x80] sm:$0xff]   ;;  %v4434_v25 = vld [vmem:[#allocation7 + $0x88] sm:$0xff]  }
  0x46   :  { %v4435_v26 = vld [vmem:[#allocation7 + $0x90] sm:$0xff]   ;;  %v4436_v27 = vld [vmem:[#allocation7 + $0x98] sm:$0xff]   ;;  %v4437_v28 = vld [vmem:[#allocation7 + $0xa0] sm:$0xff]  }
  0x47   :  { %4098 = vmatpush3.bf16.msra.mxu0 %v4411_v2  ;;  %v4438_v29 = vld [vmem:[#allocation7 + $0xa8] sm:$0xff]   ;;  %v4439_v30 = vld [vmem:[#allocation7 + $0xb0] sm:$0xff]   ;;  %v4440_v31 = vld [vmem:[#allocation7 + $0xb8] sm:$0xff]  }
  0x48   :  { %4099 = vmatprep.subr.bf16.mxu0 %v4412_v3  ;;  %v4441_v32 = vld [vmem:[#allocation7 + $0xc0] sm:$0xff]   ;;  %v4442_v33 = vld [vmem:[#allocation7 + $0xc8] sm:$0xff]   ;;  %v4443_v34 = vld [vmem:[#allocation7 + $0xd0] sm:$0xff]  }
  0x49   :  { %v4444_v35 = vld [vmem:[#allocation7 + $0xd8] sm:$0xff]   ;;  %v4445_v36 = vld [vmem:[#allocation7 + $0xe0] sm:$0xff]   ;;  %v4446_v37 = vld [vmem:[#allocation7 + $0xe8] sm:$0xff]  }
  0x4a   :  { %v4447_v38 = vld [vmem:[#allocation7 + $0xf0] sm:$0xff]   ;;  %v4448_v39 = vld [vmem:[#allocation7 + $0xf8] sm:$0xff]   ;;  %v4449_v40 = vld [vmem:[#allocation7 + $0x100] sm:$0xff]  }
  0x4b   :  { %4100 = vmatpush3.bf16.msra.mxu0 %v4412_v3  ;;  %v4450_v41 = vld [vmem:[#allocation7 + $0x108] sm:$0xff]   ;;  %v4451_v42 = vld [vmem:[#allocation7 + $0x110] sm:$0xff]   ;;  %v4452_v43 = vld [vmem:[#allocation7 + $0x118] sm:$0xff]   ;;  %v4921_v3 = vsub.s32 0, %v4905_v59 }
  0x4c   :  { %4101 = vmatprep.subr.bf16.mxu0 %v4413_v5  ;;  %v4453_v44 = vld [vmem:[#allocation7 + $0x120] sm:$0xff]   ;;  %v4454_v45 = vld [vmem:[#allocation7 + $0x128] sm:$0xff]   ;;  %v4455_v46 = vld [vmem:[#allocation7 + $0x130] sm:$0xff]  }
  0x4d   :  { %v4456_v47 = vld [vmem:[#allocation7 + $0x138] sm:$0xff]   ;;  %v4457_v48 = vld [vmem:[#allocation7 + $0x140] sm:$0xff]   ;;  %v4458_v49 = vld [vmem:[#allocation7 + $0x148] sm:$0xff]  }
  0x4e   :  { %v4459_v50 = vld [vmem:[#allocation7 + $0x150] sm:$0xff]   ;;  %v4460_v51 = vld [vmem:[#allocation7 + $0x158] sm:$0xff]   ;;  %v4461_v52 = vld [vmem:[#allocation7 + $0x160] sm:$0xff]  }
  0x4f   :  { %4102 = vmatpush3.bf16.msra.mxu0 %v4413_v5  ;;  %v4462_v53 = vld [vmem:[#allocation7 + $0x168] sm:$0xff]   ;;  %v4463_v54 = vld [vmem:[#allocation7 + $0x170] sm:$0xff]   ;;  %v4464_v60 = vld [vmem:[#allocation7 + $0x178] sm:$0xff]  }
  0x50   :  { %4103 = vmatprep.subr.bf16.mxu0 %v4414_v6  ;;  %v4465_v61 = vld [vmem:[#allocation7 + $0x180] sm:$0xff]   ;;  %v4910_v63 = vld [vmem:[#allocation5] sm:$0xff]  ;;  %v4466_v1 = vld [vmem:[#allocation7 + $0x188] sm:$0xff]  }
  0x51   :  { %v4914_v0 = vrot.slane %v4910_v63, %v4908_v62  ;;  %v4467_v4 = vld [vmem:[#allocation7 + $0x190] sm:$0xff]  }
  0x53   :  { %4104 = vmatpush3.bf16.msra.mxu0 %v4414_v6  ;;  %v4918_v2 = vrot.slane %v4914_v0, %v4908_v62 }
  0x54   :  { %4105 = vmatprep.subr.bf16.mxu0 %v4415_v7 }
  0x55   :  { %v4925_v6 = vrot.slane %v4918_v2, %v4921_v3 }
  0x57   :  { %4106 = vmatpush3.bf16.msra.mxu0 %v4415_v7 }
  0x58   :  { %4107 = vmatprep.subr.bf16.mxu0 %v4416_v8 }
  0x5b   :  { %4108 = vmatpush3.bf16.msra.mxu0 %v4416_v8 }
  0x5e   :  { %4110 = vmatmul.mubr.bf16.vlgmr.msra.gmra.mxu0 %v4418_v9  ;;  %v4468_v9 = vld [vmem:[#allocation7 + $0x198] sm:$0xff]  }
  0x5f   :  { %4113 = vmatprep.mubr.bf16.mxu0 %v4419_v10 }
  0x66   :  { %4114 = vmatmul.mubr.bf16.gmra.mxu0 %v4420_v11 }
  0x67   :  { %4117 = vmatprep.mubr.bf16.mxu0 %v4421_v12  ;;  %v4469_v12 = vld [vmem:[#allocation7 + $0x1a0] sm:$0xff]  }
  0x6e   :  { %4118 = vmatmul.mubr.bf16.gmra.mxu0 %v4422_v13 }
  0x6f   :  { %4121 = vmatprep.mubr.bf16.mxu0 %v4423_v14 }
  0x76   :  { %4122 = vmatmul.mubr.bf16.gmra.mxu0 %v4424_v15 }
  0x77   :  { %4125 = vmatprep.mubr.bf16.mxu0 %v4425_v16 }
  0x7e   :  { %4126 = vmatmul.mubr.bf16.gmra.mxu0 %v4426_v17 }
  0x7f   :  { %4129 = vmatprep.mubr.bf16.mxu0 %v4427_v18 }
  0x86   :  { %4130 = vmatmul.mubr.bf16.gmra.mxu0 %v4428_v19 }
  0x87   :  { %4133 = vmatprep.mubr.bf16.mxu0 %v4429_v20 }
  0x8e   :  { %4134 = vmatmul.mubr.bf16.gmra.mxu0 %v4430_v21  ;;  %v4470_v21 = vld [vmem:[#allocation7 + $0x1a8] sm:$0xff]  }
  0x8f   :  { %4137 = vmatprep.mubr.bf16.mxu0 %v4431_v22 }
  0x96   :  { %4138 = vmatmul.mubr.bf16.gmra.mxu0 %v4432_v23  ;;  %v4471_v23 = vld [vmem:[#allocation7 + $0x1b0] sm:$0xff]  }
  0x97   :  { %4141 = vmatprep.mubr.bf16.mxu0 %v4433_v24  ;;  %v1560_v24 = vld [vmem:[%s5757_s5] sm:$0x1]  ;;  %s4838_s5 = smov [#allocation12]  }
  0x98   :  { %s3798_s25 = sshll.u32 %s4838_s5, 4  ;;  %s3799_s25 = int_to_ptr.vmem [resolvable:$true] %s3798_s25 }
  0x99   :  { %s4778_s26 = scalar_lea.vmem %s3799_s25, 128  ;;  %p4783_p12 = scmp.lt.s32.totalorder %s3799_s25, %s3799_s25 }
  0x9a   :  { %p4779_p11 = scmp.ne.s32.totalorder %s3799_s25, %s4778_s26  ;;  %p4784_p13 = scmp.lt.s32.totalorder %s4778_s26, %s4778_s26 }
  0x9c   :  { %p4785_p0 = por %p4784_p13, %p4783_p12 }
  0x9e   :  { %4142 = vmatmul.mubr.bf16.gmra.mxu0 %v4434_v25  ;;  %p4786_p1 = pnand %p4785_p0, %p4779_p11 }
  0x9f   :  { %4145 = vmatprep.mubr.bf16.mxu0 %v4435_v26 }
  0xa6   :  { %4146 = vmatmul.mubr.bf16.gmra.mxu0 %v4436_v27 }
  0xa7   :  { %4149 = vmatprep.mubr.bf16.mxu0 %v4437_v28 }
  0xae   :  { %4150 = vmatmul.mubr.bf16.gmra.mxu0 %v4438_v29 }
  0xaf   :  { %4153 = vmatprep.mubr.bf16.mxu0 %v4439_v30  ;;  %v1562_v30 = vpack.i.b16 %v1560_v24, %v1560_v24 }
  0xb6   :  { %4154 = vmatmul.mubr.bf16.gmra.mxu0 %v4440_v31 }
  0xb7   :  { %4157 = vmatprep.mubr.bf16.mxu0 %v4441_v32 }
  0xbe   :  { %4158 = vmatmul.mubr.bf16.gmra.mxu0 %v4442_v33 }
  0xbf   :  { %4161 = vmatprep.mubr.bf16.mxu0 %v4443_v34 }
  0xc6   :  { %4162 = vmatmul.mubr.bf16.gmra.mxu0 %v4444_v35  ;;  %v4472_v35 = vld [vmem:[#allocation7 + $0x1b8] sm:$0xff]  }
  0xc7   :  { %4165 = vmatprep.mubr.bf16.mxu0 %v4445_v36  ;;  %v4939_v36 = vrot.slane %v1562_v30, %v4921_v3 }
  0xce   :  { %4166 = vmatmul.mubr.bf16.gmra.mxu0 %v4446_v37 }
  0xcf   :  { %4169 = vmatprep.mubr.bf16.mxu0 %v4447_v38 }
  0xd6   :  { %4170 = vmatmul.mubr.bf16.gmra.mxu0 %v4448_v39  ;;  %v4473_v39 = vld [vmem:[#allocation7 + $0x1c0] sm:$0xff]  }
  0xd7   :  { %4173 = vmatprep.mubr.bf16.mxu0 %v4449_v40 }
  0xde   :  { %4174 = vmatmul.mubr.bf16.gmra.mxu0 %v4450_v41 }
  0xdf   :  { %4177 = vmatprep.mubr.bf16.mxu0 %v4451_v42 }
  0xe6   :  { %4178 = vmatmul.mubr.bf16.gmra.mxu0 %v4452_v43 }
  0xe7   :  { %4181 = vmatprep.mubr.bf16.mxu0 %v4453_v44 }
  0xee   :  { %4182 = vmatmul.mubr.bf16.gmra.mxu0 %v4454_v45 }
  0xef   :  { %4185 = vmatprep.mubr.bf16.mxu0 %v4455_v46 }
  0xf6   :  { %4186 = vmatmul.mubr.bf16.gmra.mxu0 %v4456_v47 }
  0xf7   :  { %4189 = vmatprep.mubr.bf16.mxu0 %v4457_v48 }
  0xfe   :  { %4190 = vmatmul.mubr.bf16.gmra.mxu0 %v4458_v49 }
  0xff   :  { %4193 = vmatprep.mubr.bf16.mxu0 %v4459_v50 }
 0x106   :  { %4194 = vmatmul.mubr.bf16.gmra.mxu0 %v4460_v51 }
 0x107   :  { %4197 = vmatprep.mubr.bf16.mxu0 %v4461_v52  ;;  %v4474_v52 = vld [vmem:[#allocation7 + $0x1c8] sm:$0xff]  }
 0x10e   :  { %4198 = vmatmul.mubr.bf16.gmra.mxu0 %v4462_v53  ;;  %v4475_v53 = vld [vmem:[#allocation7 + $0x1d0] sm:$0xff]  }
 0x10f   :  { %4201 = vmatprep.mubr.bf16.mxu0 %v4463_v54 }
 0x116   :  { %4202 = vmatmul.mubr.bf16.gmra.mxu0 %v4464_v60 }
 0x117   :  { %4205 = vmatprep.mubr.bf16.mxu0 %v4465_v61 }
 0x11e   :  { %v4111_v5 = vpop.f32.mrf.mxu0  ;;  %4206 = vmatmul.mubr.bf16.gmra.mxu0 %v4466_v1 }
 0x11f   :  { %4209 = vmatprep.mubr.bf16.mxu0 %v4467_v4  ;;  %v1306_v10 = vadd.f32 %v4111_v5, %v4925_v6 }
 0x120   :  { %v702_v7 = vpop.f32.mrf.mxu0 }
 0x121   :  { %v1304_v14 = vadd.f32 %v4925_v6, %v702_v7 }
 0x122   :  { %v4112_v8 = vpop.f32.mrf.mxu0 }
 0x123   :  { %v1307_v11 = vadd.f32 %v4112_v8, %v4925_v6 }
 0x124   :  { %v705_v13 = vpop.f32.mrf.mxu0 }
 0x125   :  { %v1433_v15 = vpack.c.bf16 %v1307_v11, %v1306_v10  ;;  %v1305_v16 = vadd.f32 %v4925_v6, %v705_v13  ;;  %v1230_v13 = vcombine.high %v4914_v0, %v4914_v0 }
 0x126   :  { %v4115_v17 = vpop.f32.mrf.mxu0  ;;  %4210 = vmatmul.mubr.bf16.gmra.mxu0 %v4468_v9 }
 0x127   :  { %4546 = vtanh.bf16 %v1433_v15  ;;  %v1432_v18 = vpack.c.bf16 %v1305_v16, %v1304_v14  ;;  %4213 = vmatprep.mubr.bf16.mxu0 %v4469_v12  ;;  %v1310_v26 = vadd.f32 %v4115_v17, %v4925_v6  ;;  %v4476_v12 = vld [vmem:[#allocation7 + $0x1d8] sm:$0xff]   ;;  %v4477_v14 = vld [vmem:[#allocation7 + $0x1e0] sm:$0xff]   ;;  %v4961_v0 = vrot.slane %v1230_v13, %v4908_v62 }
 0x128   :  { %v718_v19 = vpop.f32.mrf.mxu0 }
 0x129   :  { %4548 = vtanh.bf16 %v1432_v18  ;;  %v1308_v27 = vadd.f32 %v4925_v6, %v718_v19 }
 0x12a   :  { %v4116_v20 = vpop.f32.mrf.mxu0 }
 0x12b   :  { %v1311_v22 = vadd.f32 %v4116_v20, %v4925_v6 }
 0x12c   :  { %v721_v25 = vpop.f32.mrf.mxu0 }
 0x12d   :  { %v1309_v28 = vadd.f32 %v4925_v6, %v721_v25  ;;  %v1435_v31 = vpack.c.bf16 %v1311_v22, %v1310_v26 }
 0x12e   :  { %v4119_v29 = vpop.f32.mrf.mxu0  ;;  %4214 = vmatmul.mubr.bf16.gmra.mxu0 %v4470_v21 }
 0x12f   :  { %v1434_v32 = vpack.c.bf16 %v1309_v28, %v1308_v27  ;;  %4217 = vmatprep.mubr.bf16.mxu0 %v4471_v23  ;;  %v1314_v37 = vadd.f32 %v4119_v29, %v4925_v6  ;;  %v4478_v29 = vld [vmem:[#allocation7 + $0x1e8] sm:$0xff]  }
 0x130   :  { %v734_v33 = vpop.f32.mrf.mxu0 }
 0x131   :  { %4550 = vtanh.bf16 %v1434_v32  ;;  %v1312_v46 = vadd.f32 %v4925_v6, %v734_v33  ;;  %v4479_v32 = vld [vmem:[#allocation7 + $0x1f0] sm:$0xff]  }
 0x132   :  { %v4120_v34 = vpop.f32.mrf.mxu0  ;;  %4552 = vtanh.bf16 %v1435_v31  ;;  %v4965_v31 = vrot.slane %v4961_v0, %v4921_v3 }
 0x133   :  { %v1315_v38 = vadd.f32 %v4120_v34, %v4925_v6 }
 0x134   :  { %v737_v40 = vpop.f32.mrf.mxu0 }
 0x135   :  { %v4547_v41 = vpop.eup %4546  ;;  %v1437_v42 = vpack.c.bf16 %v1315_v38, %v1314_v37  ;;  %v1313_v43 = vadd.f32 %v4925_v6, %v737_v40 }
 0x136   :  { %v4123_v44 = vpop.f32.mrf.mxu0  ;;  %4218 = vmatmul.mubr.bf16.gmra.mxu0 %v4472_v35  ;;  %v1569_v45 = vmul.bf16 %v4547_v41, %v4939_v36 }
 0x137   :  { %4554 = vtanh.bf16 %v1437_v42  ;;  %4221 = vmatprep.mubr.bf16.mxu0 %v4473_v39  ;;  %v4549_v49 = vpop.eup %4548  ;;  %v1436_v50 = vpack.c.bf16 %v1313_v43, %v1312_v46  ;;  %v1318_v1 = vadd.f32 %v4123_v44, %v4925_v6 }
 0x138   :  { %v750_v47 = vpop.f32.mrf.mxu0  ;;  %v1634_v48 = vunpack.c.l.bf16 %v1569_v45  ;;  %v1635_v55 = vunpack.c.h.bf16 %v1569_v45  ;;  %v1568_v56 = vmul.bf16 %v4549_v49, %v4939_v36 }
 0x139   :  { %4556 = vtanh.bf16 %v1436_v50  ;;  %v1316_v23 = vadd.f32 %v4925_v6, %v750_v47  ;;  %v4480_v47 = vld [vmem:[#allocation7 + $0x1f8] sm:$0xff]  }
 0x13a   :  { %1764 = vadd.xlane.f32.xlu0 %v1634_v48  ;;  %v4124_v51 = vpop.f32.mrf.mxu0  ;;  %v1632_v5 = vunpack.c.l.bf16 %v1568_v56  ;;  %v1633_v16 = vunpack.c.h.bf16 %v1568_v56 }
 0x13b   :  { %v1319_v58 = vadd.f32 %v4124_v51, %v4925_v6 }
 0x13c   :  { %v753_v54 = vpop.f32.mrf.mxu0 }
 0x13d   :  { %v1439_v9 = vpack.c.bf16 %v1319_v58, %v1318_v1  ;;  %v1317_v19 = vadd.f32 %v4925_v6, %v753_v54 }
 0x13e   :  { %1766 = vadd.xlane.f32.xlu0 %v1635_v55  ;;  %v4127_v60 = vpop.f32.mrf.mxu0  ;;  %4222 = vmatmul.mubr.bf16.gmra.mxu0 %v4474_v52 }
 0x13f   :  { %v4551_v61 = vpop.eup %4550  ;;  %4225 = vmatprep.mubr.bf16.mxu0 %v4475_v53  ;;  %4558 = vtanh.bf16 %v1439_v9  ;;  %v1438_v26 = vpack.c.bf16 %v1317_v19, %v1316_v23  ;;  %v1322_v41 = vadd.f32 %v4127_v60, %v4965_v31  ;;  %v1260_v19 = vcombine.high %v4918_v2, %v4918_v2 }
 0x140   :  { %v4949_v4 = vpop.f32.mrf.mxu0  ;;  %v1570_v7 = vmul.bf16 %v4551_v61, %v4939_v36  ;;  %v4553_v8 = vpop.eup %4552 }
 0x141   :  { %v1571_v17 = vmul.bf16 %v4553_v8, %v4939_v36  ;;  %4560 = vtanh.bf16 %v1438_v26  ;;  %v1320_v55 = vadd.f32 %v4965_v31, %v4949_v4 }
 0x142   :  { %1760 = vadd.xlane.f32.xlu0 %v1632_v5  ;;  %v4128_v10 = vpop.f32.mrf.mxu0  ;;  %v1636_v11 = vunpack.c.l.bf16 %v1570_v7  ;;  %v1637_v21 = vunpack.c.h.bf16 %v1570_v7 }
 0x143   :  { %v1638_v25 = vunpack.c.l.bf16 %v1571_v17  ;;  %v1639_v33 = vunpack.c.h.bf16 %v1571_v17  ;;  %v1323_v34 = vadd.f32 %v4128_v10, %v4965_v31 }
 0x144   :  { %1768 = vadd.xlane.f32.xlu1 %v1636_v11  ;;  %v769_v15 = vpop.f32.mrf.mxu0 }
 0x145   :  { %v4555_v18 = vpop.eup %4554  ;;  %v1441_v44 = vpack.c.bf16 %v1323_v34, %v1322_v41  ;;  %v1321_v51 = vadd.f32 %v4965_v31, %v769_v15 }
 0x146   :  { %1762 = vadd.xlane.f32.xlu0 %v1633_v16  ;;  %v4956_v20 = vpop.f32.mrf.mxu0  ;;  %4226 = vmatmul.mubr.bf16.gmra.mxu0 %v4476_v12  ;;  %v1573_v22 = vmul.bf16 %v4555_v18, %v4939_v36 }
 0x147   :  { %4229 = vmatprep.mubr.bf16.mxu0 %v4477_v14  ;;  %v4557_v30 = vpop.eup %4556  ;;  %v1440_v1 = vpack.c.bf16 %v1321_v51, %v1320_v55  ;;  %v1326_v13 = vadd.f32 %v4956_v20, %v4965_v31 }
 0x148   :  { %1770 = vadd.xlane.f32.xlu1 %v1637_v21  ;;  %v782_v24 = vpop.f32.mrf.mxu0  ;;  %v1642_v28 = vunpack.c.l.bf16 %v1573_v22  ;;  %v1643_v39 = vunpack.c.h.bf16 %v1573_v22  ;;  %v1572_v40 = vmul.bf16 %v4557_v30, %v4939_v36 }
 0x149   :  { %v1324_v35 = vadd.f32 %v4965_v31, %v782_v24 }
 0x14a   :  { %1772 = vadd.xlane.f32.xlu0 %v1638_v25  ;;  %v4132_v27 = vpop.f32.mrf.mxu0  ;;  %v1640_v46 = vunpack.c.l.bf16 %v1572_v40  ;;  %v1641_v58 = vunpack.c.h.bf16 %v1572_v40 }
 0x14b   :  { %v1327_v11 = vadd.f32 %v4132_v27, %v4965_v31 }
 0x14c   :  { %1780 = vadd.xlane.f32.xlu1 %v1642_v28  ;;  %v785_v6 = vpop.f32.mrf.mxu0  ;;  %v4990_v28 = vrot.slane %v1260_v19, %v4921_v3 }
 0x14d   :  { %v1325_v37 = vadd.f32 %v4965_v31, %v785_v6  ;;  %v4559_v48 = vpop.eup %4558  ;;  %v1443_v21 = vpack.c.bf16 %v1327_v11, %v1326_v13 }
 0x14e   :  { %1774 = vadd.xlane.f32.xlu0 %v1639_v33  ;;  %v4135_v38 = vpop.f32.mrf.mxu0  ;;  %4230 = vmatmul.mubr.bf16.gmra.mxu0 %v4478_v29  ;;  %v1575_v60 = vmul.bf16 %v4559_v48, %v4939_v36 }
 0x14f   :  { %v1442_v42 = vpack.c.bf16 %v1325_v37, %v1324_v35  ;;  %4233 = vmatprep.mubr.bf16.mxu0 %v4479_v32  ;;  %v1330_v49 = vadd.f32 %v4135_v38, %v4965_v31  ;;  %v4561_v10 = vpop.eup %4560 }
 0x150   :  { %1782 = vadd.xlane.f32.xlu1 %v1643_v39  ;;  %v798_v43 = vpop.f32.mrf.mxu0  ;;  %v1646_v9 = vunpack.c.l.bf16 %v1575_v60  ;;  %v1647_v15 = vunpack.c.h.bf16 %v1575_v60  ;;  %v1574_v16 = vmul.bf16 %v4561_v10, %v4939_v36 }
 0x151   :  { %4562 = vtanh.bf16 %v1442_v42  ;;  %v1328_v61 = vadd.f32 %v4965_v31, %v798_v43 }
 0x152   :  { %v4136_v45 = vpop.f32.mrf.mxu0  ;;  %4564 = vtanh.bf16 %v1441_v44  ;;  %v1644_v26 = vunpack.c.l.bf16 %v1574_v16  ;;  %v1645_v6 = vunpack.c.h.bf16 %v1574_v16 }
 0x153   :  { %v1331_v50 = vadd.f32 %v4136_v45, %v4965_v31 }
 0x154   :  { %1776 = vadd.xlane.f32.xlu1 %v1640_v46  ;;  %v801_v52 = vpop.f32.mrf.mxu0 }
 0x155   :  { %v1445_v53 = vpack.c.bf16 %v1331_v50, %v1330_v49  ;;  %v1329_v54 = vadd.f32 %v4965_v31, %v801_v52 }
 0x156   :  { %v4139_v56 = vpop.f32.mrf.mxu0  ;;  %4234 = vmatmul.mubr.bf16.gmra.mxu0 %v4480_v47 }
 0x157   :  { %4566 = vtanh.bf16 %v1445_v53  ;;  %v1444_v7 = vpack.c.bf16 %v1329_v54, %v1328_v61  ;;  %v1334_v18 = vadd.f32 %v4139_v56, %v4965_v31 }
 0x158   :  { %1778 = vadd.xlane.f32.xlu1 %v1641_v58  ;;  %v814_v5 = vpop.f32.mrf.mxu0  ;;  %4568 = vtanh.bf16 %v1440_v1 }
 0x159   :  { %4570 = vtanh.bf16 %v1444_v7  ;;  %v1332_v33 = vadd.f32 %v4965_v31, %v814_v5 }
 0x15a   :  { %v4140_v8 = vpop.f32.mrf.mxu0  ;;  %4572 = vtanh.bf16 %v1443_v21 }
 0x15b   :  { %v1335_v12 = vadd.f32 %v4140_v8, %v4965_v31 }
 0x15c   :  { %1788 = vadd.xlane.f32.xlu1 %v1646_v9  ;;  %v817_v4 = vpop.f32.mrf.mxu0 }
 0x15d   :  { %v1447_v24 = vpack.c.bf16 %v1335_v12, %v1334_v18  ;;  %v1333_v29 = vadd.f32 %v4965_v31, %v817_v4 }
 0x15e   :  { %v4143_v14 = vpop.f32.mrf.mxu0 }
 0x15f   :  { %v4563_v17 = vpop.eup %4562  ;;  %4574 = vtanh.bf16 %v1447_v24  ;;  %v1338_v39 = vadd.f32 %v4143_v14, %v4990_v28  ;;  %v1446_v40 = vpack.c.bf16 %v1333_v29, %v1332_v33 }
 0x160   :  { %1790 = vadd.xlane.f32.xlu1 %v1647_v15  ;;  %v830_v22 = vpop.f32.mrf.mxu0  ;;  %v1578_v23 = vmul.bf16 %v4563_v17, %v4939_v36  ;;  %v4565_v20 = vpop.eup %4564 }
 0x161   :  { %v1577_v37 = vmul.bf16 %v4565_v20, %v4939_v36  ;;  %v1336_v48 = vadd.f32 %v4990_v28, %v830_v22  ;;  %4576 = vtanh.bf16 %v1446_v40  ;;  %v1262_v20 = vcombine.high %v4961_v0, %v4961_v0 }
 0x162   :  { %v4144_v25 = vpop.f32.mrf.mxu0  ;;  %v1652_v27 = vunpack.c.l.bf16 %v1578_v23  ;;  %v1653_v35 = vunpack.c.h.bf16 %v1578_v23 }
 0x163   :  { %v1339_v32 = vadd.f32 %v4144_v25, %v4990_v28  ;;  %v1650_v46 = vunpack.c.l.bf16 %v1577_v37  ;;  %v1651_v53 = vunpack.c.h.bf16 %v1577_v37 }
 0x164   :  { %1784 = vadd.xlane.f32.xlu1 %v1644_v26  ;;  %1800 = vadd.xlane.f32.xlu0 %v1652_v27  ;;  %v833_v30 = vpop.f32.mrf.mxu0 }
 0x165   :  { %v4567_v2 = vpop.eup %4566  ;;  %v1449_v42 = vpack.c.bf16 %v1339_v32, %v1338_v39  ;;  %v1337_v43 = vadd.f32 %v4990_v28, %v833_v30 }
 0x166   :  { %v4147_v34 = vpop.f32.mrf.mxu0  ;;  %v1581_v38 = vmul.bf16 %v4567_v2, %v4939_v36  ;;  %v4569_v44 = vpop.eup %4568 }
 0x167   :  { %v4571_v31 = vpop.eup %4570  ;;  %4578 = vtanh.bf16 %v1449_v42  ;;  %v1448_v50 = vpack.c.bf16 %v1337_v43, %v1336_v48  ;;  %v1576_v55 = vmul.bf16 %v4569_v44, %v4939_v36  ;;  %v1342_v58 = vadd.f32 %v4147_v34, %v4990_v28 }
 0x168   :  { %1786 = vadd.xlane.f32.xlu1 %v1645_v6  ;;  %1802 = vadd.xlane.f32.xlu0 %v1653_v35  ;;  %v846_v41 = vpop.f32.mrf.mxu0  ;;  %v1658_v47 = vunpack.c.l.bf16 %v1581_v38  ;;  %v1659_v54 = vunpack.c.h.bf16 %v1581_v38  ;;  %v1580_v56 = vmul.bf16 %v4571_v31, %v4939_v36  ;;  %v4573_v5 = vpop.eup %4572  ;;  %v5019_v38 = vrot.slane %v1262_v20, %v4921_v3 }
 0x169   :  { %4580 = vtanh.bf16 %v1448_v50  ;;  %v1648_v8 = vunpack.c.l.bf16 %v1576_v55  ;;  %v1340_v11 = vadd.f32 %v4990_v28, %v846_v41  ;;  %v1649_v15 = vunpack.c.h.bf16 %v1576_v55 }
 0x16a   :  { %v4148_v45 = vpop.f32.mrf.mxu0  ;;  %v1656_v9 = vunpack.c.l.bf16 %v1580_v56  ;;  %v1657_v16 = vunpack.c.h.bf16 %v1580_v56  ;;  %v1579_v17 = vmul.bf16 %v4573_v5, %v4939_v36 }
 0x16b   :  { %v1343_v51 = vadd.f32 %v4148_v45, %v4990_v28 }
 0x16c   :  { %1796 = vadd.xlane.f32.xlu1 %v1650_v46  ;;  %1812 = vadd.xlane.f32.xlu0 %v1658_v47  ;;  %v849_v49 = vpop.f32.mrf.mxu0  ;;  %v1654_v25 = vunpack.c.l.bf16 %v1579_v17  ;;  %v1655_v32 = vunpack.c.h.bf16 %v1579_v17 }
 0x16d   :  { %v1451_v61 = vpack.c.bf16 %v1343_v51, %v1342_v58  ;;  %v1341_v1 = vadd.f32 %v4990_v28, %v849_v49  ;;  %v4575_v10 = vpop.eup %4574 }
 0x16e   :  { %v4151_v52 = vpop.f32.mrf.mxu0  ;;  %v1583_v18 = vmul.bf16 %v4575_v10, %v4939_v36 }
 0x16f   :  { %4582 = vtanh.bf16 %v1451_v61  ;;  %v1450_v12 = vpack.c.bf16 %v1341_v1, %v1340_v11  ;;  %v1346_v19 = vadd.f32 %v4151_v52, %v4990_v28  ;;  %v4577_v23 = vpop.eup %4576 }
 0x170   :  { %1798 = vadd.xlane.f32.xlu1 %v1651_v53  ;;  %1814 = vadd.xlane.f32.xlu0 %v1659_v54  ;;  %v862_v60 = vpop.f32.mrf.mxu0  ;;  %v1662_v26 = vunpack.c.l.bf16 %v1583_v18  ;;  %v1663_v6 = vunpack.c.h.bf16 %v1583_v18  ;;  %v1582_v33 = vmul.bf16 %v4577_v23, %v4939_v36 }
 0x171   :  { %4584 = vtanh.bf16 %v1450_v12  ;;  %v1344_v37 = vadd.f32 %v4990_v28, %v862_v60 }
 0x172   :  { %v4152_v7 = vpop.f32.mrf.mxu0  ;;  %v1660_v41 = vunpack.c.l.bf16 %v1582_v33  ;;  %v1661_v52 = vunpack.c.h.bf16 %v1582_v33 }
 0x173   :  { %v1347_v13 = vadd.f32 %v4152_v7, %v4990_v28 }
 0x174   :  { %1792 = vadd.xlane.f32.xlu1 %v1648_v8  ;;  %1808 = vadd.xlane.f32.xlu0 %v1656_v9  ;;  %v865_v4 = vpop.f32.mrf.mxu0 }
 0x175   :  { %v1453_v22 = vpack.c.bf16 %v1347_v13, %v1346_v19  ;;  %v4579_v27 = vpop.eup %4578  ;;  %v1345_v30 = vadd.f32 %v4990_v28, %v865_v4 }
 0x176   :  { %v4155_v14 = vpop.f32.mrf.mxu0  ;;  %v1585_v34 = vmul.bf16 %v4579_v27, %v4939_v36 }
 0x177   :  { %4586 = vtanh.bf16 %v1453_v22  ;;  %v4581_v35 = vpop.eup %4580  ;;  %v1452_v39 = vpack.c.bf16 %v1345_v30, %v1344_v37  ;;  %v1350_v50 = vadd.f32 %v4155_v14, %v4990_v28 }
 0x178   :  { %1794 = vadd.xlane.f32.xlu1 %v1649_v15  ;;  %1810 = vadd.xlane.f32.xlu0 %v1657_v16  ;;  %v5010_v21 = vpop.f32.mrf.mxu0  ;;  %v1667_v42 = vunpack.c.h.bf16 %v1585_v34  ;;  %v1584_v43 = vmul.bf16 %v4581_v35, %v4939_v36  ;;  %v1666_v5 = vunpack.c.l.bf16 %v1585_v34  ;;  %v1215_v34 = vcombine.high %v4910_v63, %v4910_v63 }
 0x179   :  { %4588 = vtanh.bf16 %v1452_v39  ;;  %v1348_v18 = vadd.f32 %v4990_v28, %v5010_v21 }
 0x17a   :  { %v4156_v24 = vpop.f32.mrf.mxu0  ;;  %v1665_v53 = vunpack.c.h.bf16 %v1584_v43  ;;  %v1664_v15 = vunpack.c.l.bf16 %v1584_v43 }
 0x17b   :  { %v1351_v47 = vadd.f32 %v4156_v24, %v4990_v28 }
 0x17c   :  { %1804 = vadd.xlane.f32.xlu1 %v1654_v25  ;;  %1820 = vadd.xlane.f32.xlu0 %v1662_v26  ;;  %v881_v29 = vpop.f32.mrf.mxu0 }
 0x17d   :  { %v4583_v44 = vpop.eup %4582  ;;  %v1455_v58 = vpack.c.bf16 %v1351_v47, %v1350_v50  ;;  %v1349_v12 = vadd.f32 %v4990_v28, %v881_v29 }
 0x17e   :  { %v4159_v2 = vpop.f32.mrf.mxu0  ;;  %v1587_v54 = vmul.bf16 %v4583_v44, %v4939_v36 }
 0x17f   :  { %v1354_v45 = vadd.f32 %v4159_v2, %v5019_v38  ;;  %v4585_v55 = vpop.eup %4584  ;;  %v1454_v22 = vpack.c.bf16 %v1349_v12, %v1348_v18 }
 0x180   :  { %1806 = vadd.xlane.f32.xlu1 %v1655_v32  ;;  %1822 = vadd.xlane.f32.xlu0 %v1663_v6  ;;  %v894_v0 = vpop.f32.mrf.mxu0  ;;  %v1671_v7 = vunpack.c.h.bf16 %v1587_v54  ;;  %v1586_v8 = vmul.bf16 %v4585_v55, %v4939_v36  ;;  %v1670_v24 = vunpack.c.l.bf16 %v1587_v54 }
 0x181   :  { %v1352_v56 = vadd.f32 %v5019_v38, %v894_v0 }
 0x182   :  { %v4160_v40 = vpop.f32.mrf.mxu0  ;;  %v1668_v16 = vunpack.c.l.bf16 %v1586_v8  ;;  %v1669_v21 = vunpack.c.h.bf16 %v1586_v8 }
 0x183   :  { %v1355_v46 = vadd.f32 %v4160_v40, %v5019_v38 }
 0x184   :  { %1816 = vadd.xlane.f32.xlu0 %v1660_v41  ;;  %1830 = vadd.xlane.f32.xlu1 %v1667_v42  ;;  %v897_v31 = vpop.f32.mrf.mxu0 }
 0x185   :  { %v1457_v48 = vpack.c.bf16 %v1355_v46, %v1354_v45  ;;  %v1353_v49 = vadd.f32 %v5019_v38, %v897_v31  ;;  %v4587_v9 = vpop.eup %4586  ;;  %v5047_v46 = vrot.slane %v1215_v34, %v4908_v62 }
 0x186   :  { %v4163_v51 = vpop.f32.mrf.mxu0  ;;  %v1589_v17 = vmul.bf16 %v4587_v9, %v4939_v36 }
 0x187   :  { %4590 = vtanh.bf16 %v1457_v48  ;;  %v1456_v61 = vpack.c.bf16 %v1353_v49, %v1352_v56  ;;  %v1358_v10 = vadd.f32 %v4163_v51, %v5019_v38  ;;  %v4589_v26 = vpop.eup %4588  ;;  %v5055_v54 = vrot.slane %v5047_v46, %v4908_v62 }
 0x188   :  { %1818 = vadd.xlane.f32.xlu0 %v1661_v52  ;;  %1826 = vadd.xlane.f32.xlu1 %v1665_v53  ;;  %v910_v60 = vpop.f32.mrf.mxu0  ;;  %4592 = vtanh.bf16 %v1455_v58  ;;  %v1674_v25 = vunpack.c.l.bf16 %v1589_v17  ;;  %v1675_v32 = vunpack.c.h.bf16 %v1589_v17  ;;  %v1588_v6 = vmul.bf16 %v4589_v26, %v4939_v36 }
 0x189   :  { %4594 = vtanh.bf16 %v1456_v61  ;;  %v1356_v40 = vadd.f32 %v5019_v38, %v910_v60  ;;  %v5063_v8 = vrot.slane %v5055_v54, %v4921_v3 }
 0x18a   :  { %v4164_v1 = vpop.f32.mrf.mxu0  ;;  %v1672_v42 = vunpack.c.l.bf16 %v1588_v6  ;;  %v1673_v49 = vunpack.c.h.bf16 %v1588_v6 }
 0x18b   :  { %v1359_v11 = vadd.f32 %v4164_v1, %v5019_v38 }
 0x18c   :  { %1828 = vadd.xlane.f32.xlu0 %v1666_v5  ;;  %1838 = vadd.xlane.f32.xlu1 %v1671_v7  ;;  %v913_v4 = vpop.f32.mrf.mxu0 }
 0x18d   :  { %v1459_v13 = vpack.c.bf16 %v1359_v11, %v1358_v10  ;;  %v1357_v35 = vadd.f32 %v5019_v38, %v913_v4 }
 0x18e   :  { %v4167_v14 = vpop.f32.mrf.mxu0 }
 0x18f   :  { %4596 = vtanh.bf16 %v1459_v13  ;;  %v1362_v27 = vadd.f32 %v4167_v14, %v5019_v38  ;;  %v1458_v63 = vpack.c.bf16 %v1357_v35, %v1356_v40 }
 0x190   :  { %1824 = vadd.xlane.f32.xlu0 %v1664_v15  ;;  %1832 = vadd.xlane.f32.xlu1 %v1668_v16  ;;  %v926_v19 = vpop.f32.mrf.mxu0  ;;  %4598 = vtanh.bf16 %v1454_v22 }
 0x191   :  { %v1360_v45 = vadd.f32 %v5019_v38, %v926_v19 }
 0x192   :  { %v4168_v23 = vpop.f32.mrf.mxu0 }
 0x193   :  { %v1363_v20 = vadd.f32 %v4168_v23, %v5019_v38 }
 0x194   :  { %1836 = vadd.xlane.f32.xlu0 %v1670_v24  ;;  %1844 = vadd.xlane.f32.xlu1 %v1674_v25  ;;  %v929_v29 = vpop.f32.mrf.mxu0 }
 0x195   :  { %v4591_v30 = vpop.eup %4590  ;;  %v1461_v2 = vpack.c.bf16 %v1363_v20, %v1362_v27  ;;  %v1361_v0 = vadd.f32 %v5019_v38, %v929_v29 }
 0x196   :  { %v4171_v28 = vpop.f32.mrf.mxu0  ;;  %v1593_v33 = vmul.bf16 %v4591_v30, %v4939_v36  ;;  %v4593_v39 = vpop.eup %4592 }
 0x197   :  { %4600 = vtanh.bf16 %v1461_v2  ;;  %v4595_v44 = vpop.eup %4594  ;;  %v1460_v31 = vpack.c.bf16 %v1361_v0, %v1360_v45  ;;  %v1591_v51 = vmul.bf16 %v4593_v39, %v4939_v36  ;;  %v1366_v7 = vadd.f32 %v4171_v28, %v5019_v38 }
 0x198   :  { %1834 = vadd.xlane.f32.xlu0 %v1669_v21  ;;  %1846 = vadd.xlane.f32.xlu1 %v1675_v32  ;;  %v942_v37 = vpop.f32.mrf.mxu0  ;;  %v1682_v43 = vunpack.c.l.bf16 %v1593_v33  ;;  %v1683_v50 = vunpack.c.h.bf16 %v1593_v33  ;;  %v5051_v52 = vmul.bf16 %v4595_v44, %v4939_v36  ;;  %4602 = vtanh.bf16 %v1458_v63 }
 0x199   :  { %4604 = vtanh.bf16 %v1460_v31  ;;  %v1678_v60 = vunpack.c.l.bf16 %v1591_v51  ;;  %v1364_v12 = vadd.f32 %v5019_v38, %v942_v37  ;;  %v1679_v14 = vunpack.c.h.bf16 %v1591_v51 }
 0x19a   :  { %v4172_v41 = vpop.f32.mrf.mxu0  ;;  %v1681_v61 = vunpack.c.h.bf16 %v5051_v52  ;;  %v1680_v39 = vunpack.c.l.bf16 %v5051_v52 }
 0x19b   :  { %v1367_v56 = vadd.f32 %v4172_v41, %v5019_v38 }
 0x19c   :  { %1840 = vadd.xlane.f32.xlu1 %v1672_v42  ;;  %1860 = vadd.xlane.f32.xlu0 %v1682_v43  ;;  %v945_v47 = vpop.f32.mrf.mxu0 }
 0x19d   :  { %v4597_v53 = vpop.eup %4596  ;;  %v1365_v9 = vadd.f32 %v5019_v38, %v945_v47  ;;  %v1463_v11 = vpack.c.bf16 %v1367_v56, %v1366_v7  ;;  %v1231_v7 = vcombine.high %v5047_v46, %v5047_v46 }
 0x19e   :  { %v4175_v48 = vpop.f32.mrf.mxu0  ;;  %v1595_v1 = vmul.bf16 %v4597_v53, %v4939_v36  ;;  %v4599_v5 = vpop.eup %4598 }
 0x19f   :  { %v1590_v16 = vmul.bf16 %v4599_v5, %v4939_v36  ;;  %v1370_v18 = vadd.f32 %v4175_v48, %v5063_v8  ;;  %v1462_v19 = vpack.c.bf16 %v1365_v9, %v1364_v12  ;;  %4606 = vtanh.bf16 %v1463_v11 }
 0x1a0   :  { %1842 = vadd.xlane.f32.xlu1 %v1673_v49  ;;  %1862 = vadd.xlane.f32.xlu0 %v1683_v50  ;;  %v958_v55 = vpop.f32.mrf.mxu0  ;;  %v1686_v15 = vunpack.c.l.bf16 %v1595_v1  ;;  %v1687_v27 = vunpack.c.h.bf16 %v1595_v1 }
 0x1a1   :  { %v1676_v26 = vunpack.c.l.bf16 %v1590_v16  ;;  %v1368_v20 = vadd.f32 %v5063_v8, %v958_v55  ;;  %4608 = vtanh.bf16 %v1462_v19  ;;  %v1677_v32 = vunpack.c.h.bf16 %v1590_v16 }
 0x1a2   :  { %v4176_v58 = vpop.f32.mrf.mxu0  ;;  %v5098_v19 = vand.u32 127, %v1219_v57 }
 0x1a3   :  { %v1371_v4 = vadd.f32 %v4176_v58, %v5063_v8 }
 0x1a4   :  { %1852 = vadd.xlane.f32.xlu1 %v1678_v60  ;;  %1858 = vadd.xlane.f32.xlu0 %v1681_v61  ;;  %v961_v10 = vpop.f32.mrf.mxu0 }
 0x1a5   :  { %v4601_v17 = vpop.eup %4600  ;;  %v1465_v23 = vpack.c.bf16 %v1371_v4, %v1370_v18  ;;  %v1369_v24 = vadd.f32 %v5063_v8, %v961_v10 }
 0x1a6   :  { %v4179_v13 = vpop.f32.mrf.mxu0  ;;  %v1597_v38 = vmul.bf16 %v4601_v17, %v4939_v36  ;;  %v4603_v28 = vpop.eup %4602  ;;  %v5094_v17 = vrot.slane %v1231_v7, %v4908_v62 }
 0x1a7   :  { %4610 = vtanh.bf16 %v1465_v23  ;;  %v1464_v30 = vpack.c.bf16 %v1369_v24, %v1368_v20  ;;  %v4605_v33 = vpop.eup %4604  ;;  %v1374_v34 = vadd.f32 %v4179_v13, %v5063_v8  ;;  %v1594_v41 = vmul.bf16 %v4603_v28, %v4939_v36 }
 0x1a8   :  { %1854 = vadd.xlane.f32.xlu1 %v1679_v14  ;;  %1868 = vadd.xlane.f32.xlu0 %v1686_v15  ;;  %v974_v22 = vpop.f32.mrf.mxu0  ;;  %v1690_v6 = vunpack.c.l.bf16 %v1597_v38  ;;  %v1691_v40 = vunpack.c.h.bf16 %v1597_v38  ;;  %v1596_v42 = vmul.bf16 %v4605_v33, %v4939_v36  ;;  %v5108_v38 = vrot.slane %v5094_v17, %v4921_v3 }
 0x1a9   :  { %4612 = vtanh.bf16 %v1464_v30  ;;  %v1372_v45 = vadd.f32 %v5063_v8, %v974_v22  ;;  %v1684_v47 = vunpack.c.l.bf16 %v1594_v41  ;;  %v1685_v56 = vunpack.c.h.bf16 %v1594_v41 }
 0x1aa   :  { %v4180_v25 = vpop.f32.mrf.mxu0  ;;  %v1688_v31 = vunpack.c.l.bf16 %v1596_v42  ;;  %v1689_v58 = vunpack.c.h.bf16 %v1596_v42  ;;  %v2179_v42 = vadd.s32 4294967256, %v5098_v19 }
 0x1ab   :  { %v1375_v2 = vadd.f32 %v4180_v25, %v5063_v8 }
 0x1ac   :  { %1848 = vadd.xlane.f32.xlu1 %v1676_v26  ;;  %1870 = vadd.xlane.f32.xlu0 %v1687_v27  ;;  %v977_v29 = vpop.f32.mrf.mxu0 }
 0x1ad   :  { %v1467_v37 = vpack.c.bf16 %v1375_v2, %v1374_v34  ;;  %v1373_v43 = vadd.f32 %v5063_v8, %v977_v29  ;;  %v4607_v48 = vpop.eup %4606  ;;  %v2158_v2 = vadd.s32 4294967280, %v5098_v19 }
 0x1ae   :  { %v4183_v21 = vpop.f32.mrf.mxu0  ;;  %v1599_v60 = vmul.bf16 %v4607_v48, %v4939_v36 }
 0x1af   :  { %4614 = vtanh.bf16 %v1467_v37  ;;  %v1466_v49 = vpack.c.bf16 %v1373_v43, %v1372_v45  ;;  %v4609_v52 = vpop.eup %4608  ;;  %v1378_v53 = vadd.f32 %v4183_v21, %v5063_v8  ;;  %v2165_v21 = vadd.s32 4294967272, %v5098_v19 }
 0x1b0   :  { %1850 = vadd.xlane.f32.xlu1 %v1677_v32  ;;  %1876 = vadd.xlane.f32.xlu0 %v1690_v6  ;;  %v990_v35 = vpop.f32.mrf.mxu0  ;;  %v1695_v12 = vunpack.c.h.bf16 %v1599_v60  ;;  %v1694_v13 = vunpack.c.l.bf16 %v1599_v60  ;;  %v1598_v14 = vmul.bf16 %v4609_v52, %v4939_v36 }
 0x1b1   :  { %4616 = vtanh.bf16 %v1466_v49  ;;  %v1376_v22 = vadd.f32 %v5063_v8, %v990_v35  ;;  %v5128_v45 = vsub.s32 %v2165_v21, %v4905_v59 }
 0x1b2   :  { %v4184_v0 = vpop.f32.mrf.mxu0  ;;  %v1692_v24 = vunpack.c.l.bf16 %v1598_v14  ;;  %v1693_v6 = vunpack.c.h.bf16 %v1598_v14 }
 0x1b3   :  { %v1379_v50 = vadd.f32 %v4184_v0, %v5063_v8  ;;  %v2172_v0 = vadd.s32 4294967264, %v5098_v19 }
 0x1b4   :  { %1856 = vadd.xlane.f32.xlu1 %v1680_v39  ;;  %1878 = vadd.xlane.f32.xlu0 %v1691_v40  ;;  %v993_v44 = vpop.f32.mrf.mxu0  ;;  %v2151_v39 = vadd.s32 4294967288, %v5098_v19 }
 0x1b5   :  { %v4611_v61 = vpop.eup %4610  ;;  %v1469_v9 = vpack.c.bf16 %v1379_v50, %v1378_v53  ;;  %v1377_v46 = vadd.f32 %v5063_v8, %v993_v44  ;;  %v5125_v44 = vsub.s32 %v2158_v2, %v4905_v59 }
 0x1b6   :  { %v4187_v63 = vpop.f32.mrf.mxu0  ;;  %v1601_v15 = vmul.bf16 %v4611_v61, %v4939_v36 }
 0x1b7   :  { %v1382_v1 = vadd.f32 %v4187_v63, %v5063_v8  ;;  %v4613_v16 = vpop.eup %4612  ;;  %4618 = vtanh.bf16 %v1469_v9  ;;  %v1468_v29 = vpack.c.bf16 %v1377_v46, %v1376_v22 }
 0x1b8   :  { %1864 = vadd.xlane.f32.xlu1 %v1684_v47  ;;  %1872 = vadd.xlane.f32.xlu0 %v1688_v31  ;;  %v5081_v51 = vpop.f32.mrf.mxu0  ;;  %v1698_v25 = vunpack.c.l.bf16 %v1601_v15  ;;  %v5104_v26 = vmul.bf16 %v4613_v16, %v4939_v36  ;;  %v5134_v31 = vsub.s32 %v5098_v19, %v4905_v59  ;;  %v1699_v48 = vunpack.c.h.bf16 %v1601_v15 }
 0x1b9   :  { %v1380_v63 = vadd.f32 %v5063_v8, %v5081_v51  ;;  %v5145_v51 = vsub.s32 %v2179_v42, %v4905_v59  ;;  %v2193_v16 = vadd.s32 4294967240, %v5098_v19 }
 0x1ba   :  { %v4188_v55 = vpop.f32.mrf.mxu0  ;;  %v1696_v33 = vunpack.c.l.bf16 %v5104_v26 }
 0x1bb   :  { %v1383_v5 = vadd.f32 %v4188_v55, %v5063_v8  ;;  %v5139_v55 = vsub.s32 %v2172_v0, %v4905_v59  ;;  %v2200_v0 = vadd.s32 4294967232, %v5098_v19 }
 0x1bc   :  { %1866 = vadd.xlane.f32.xlu1 %v1685_v56  ;;  %1874 = vadd.xlane.f32.xlu0 %v1689_v58  ;;  %v1009_v10 = vpop.f32.mrf.mxu0  ;;  %v5142_v56 = vsub.s32 %v2151_v39, %v4905_v59 }
 0x1bd   :  { %v1471_v11 = vpack.c.bf16 %v1383_v5, %v1382_v1  ;;  %v4615_v27 = vpop.eup %4614  ;;  %v1381_v40 = vadd.f32 %v5063_v8, %v1009_v10  ;;  %v1697_v10 = vunpack.c.h.bf16 %v5104_v26 }
 0x1be   :  { %v5089_v4 = vpop.f32.mrf.mxu0  ;;  %v1603_v34 = vmul.bf16 %v4615_v27, %v4939_v36 }
 0x1bf   :  { %4620 = vtanh.bf16 %v1471_v11  ;;  %v4617_v43 = vpop.eup %4616  ;;  %v1470_v58 = vpack.c.bf16 %v1381_v40, %v1380_v63 }
 0x1c0   :  { %1886 = vadd.xlane.f32.xlu1 %v1695_v12  ;;  %1884 = vadd.xlane.f32.xlu0 %v1694_v13  ;;  %v1022_v18 = vpop.f32.mrf.mxu0  ;;  %4622 = vtanh.bf16 %v1468_v29  ;;  %v1702_v49 = vunpack.c.l.bf16 %v1603_v34  ;;  %v1602_v60 = vmul.bf16 %v4617_v43, %v4939_v36  ;;  %v1703_v11 = vunpack.c.h.bf16 %v1603_v34 }
 0x1c1   :  { %v1384_v30 = vadd.f32 %v5108_v38, %v1022_v18  ;;  %v2186_v12 = vadd.s32 4294967248, %v5098_v19 }
 0x1c2   :  { %v5101_v23 = vpop.f32.mrf.mxu0 }
 0x1c3   :  { %v5110_v20 = vpop.xlane.xlu0 %1764  ;;  %v5179_v63 = vsub.s32 %v2186_v12, %v4905_v59 }
 0x1c4   :  { %1880 = vadd.xlane.f32.xlu0 %v1692_v24  ;;  %1892 = vadd.xlane.f32.xlu1 %v1698_v25  ;;  %v1025_v57 = vpop.f32.mrf.mxu0  ;;  %v1701_v24 = vunpack.c.h.bf16 %v1602_v60  ;;  %v1387_v25 = vadd.f32 %v5101_v23, %v5108_v38  ;;  %v2162_v26 = vrot.slane %v5110_v20, %v5125_v44 }
 0x1c5   :  { %v1385_v28 = vadd.f32 %v5108_v38, %v1025_v57  ;;  %v4619_v7 = vpop.eup %4618  ;;  %v1700_v57 = vunpack.c.l.bf16 %v1602_v60  ;;  %v2207_v60 = vadd.s32 4294967224, %v5098_v19 }
 0x1c6   :  { %v4195_v32 = vpop.f32.mrf.mxu0  ;;  %v1605_v21 = vmul.bf16 %v4619_v7, %v4939_v36 }
 0x1c7   :  { %v1472_v35 = vpack.c.bf16 %v1385_v28, %v1384_v30  ;;  %v5118_v37 = vpop.xlane.xlu0 %1766  ;;  %v1390_v50 = vadd.f32 %v4195_v32, %v5108_v38 }
 0x1c8   :  { %1882 = vadd.xlane.f32.xlu0 %v1693_v6  ;;  %1888 = vadd.xlane.f32.xlu1 %v1696_v33  ;;  %v1038_v41 = vpop.f32.mrf.mxu0  ;;  %v2169_v30 = vrot.slane %v5118_v37, %v5128_v45  ;;  %v1386_v6 = vadd.f32 %v5089_v4, %v5108_v38 }
 0x1c9   :  { %4624 = vtanh.bf16 %v1472_v35  ;;  %v1388_v14 = vadd.f32 %v5108_v38, %v1038_v41 }
 0x1ca   :  { %v4196_v47 = vpop.f32.mrf.mxu0  ;;  %v1473_v39 = vpack.c.bf16 %v1387_v25, %v1386_v6 }
 0x1cb   :  { %v1391_v52 = vadd.f32 %v4196_v47, %v5108_v38  ;;  %v1761_v53 = vpop.xlane.xlu0 %1760 }
 0x1cc   :  { %1894 = vadd.xlane.f32.xlu0 %v1699_v48  ;;  %1900 = vadd.xlane.f32.xlu1 %v1702_v49  ;;  %v1041_v8 = vpop.f32.mrf.mxu0  ;;  %v2150_v46 = vrot.slane %v1761_v53, %v5134_v31  ;;  %v1706_v48 = vunpack.c.l.bf16 %v1605_v21  ;;  %v5183_v53 = vsub.s32 %v2193_v16, %v4905_v59  ;;  %v2221_v16 = vadd.s32 4294967208, %v5098_v19 }
 0x1cd   :  { %v1475_v61 = vpack.c.bf16 %v1391_v52, %v1390_v50  ;;  %v1389_v1 = vadd.f32 %v5108_v38, %v1041_v8  ;;  %v1769_v5 = vpop.xlane.xlu1 %1768  ;;  %v4621_v13 = vpop.eup %4620 }
 0x1ce   :  { %v4199_v9 = vpop.f32.mrf.mxu0  ;;  %v1607_v32 = vmul.bf16 %v4621_v13, %v4939_v36  ;;  %v2176_v23 = vrot.slane %v1769_v5, %v5139_v55  ;;  %v4623_v42 = vpop.eup %4622  ;;  %v5189_v5 = vsub.s32 %v2200_v0, %v4905_v59 }
 0x1cf   :  { %4626 = vtanh.bf16 %v1475_v61  ;;  %v1763_v15 = vpop.xlane.xlu0 %1762  ;;  %v1474_v27 = vpack.c.bf16 %v1389_v1, %v1388_v14  ;;  %v1394_v52 = vadd.f32 %v4199_v9, %v5108_v38  ;;  %v1604_v7 = vmul.bf16 %v4623_v42, %v4939_v36 }
 0x1d0   :  { %4628 = vtanh.bf16 %v1470_v58  ;;  %v2155_v18 = vrot.slane %v1763_v15, %v5142_v56  ;;  %1890 = vadd.xlane.f32.xlu0 %v1697_v10  ;;  %1902 = vadd.xlane.f32.xlu1 %v1703_v11  ;;  %v5155_v22 = vpop.f32.mrf.mxu0  ;;  %v1710_v49 = vunpack.c.l.bf16 %v1607_v32  ;;  %v1707_v11 = vunpack.c.h.bf16 %v1605_v21 }
 0x1d1   :  { %v1771_v29 = vpop.xlane.xlu1 %1770  ;;  %4630 = vtanh.bf16 %v1474_v27  ;;  %v1711_v12 = vunpack.c.h.bf16 %v1607_v32  ;;  %v2214_v14 = vadd.s32 4294967216, %v5098_v19 }
 0x1d2   :  { %v2157_v2 = vsel %vm2156_vm0, %v2155_v18, %v2150_v46  ;;  %v4200_v28 = vpop.f32.mrf.mxu0  ;;  %v2183_v35 = vrot.slane %v1771_v29, %v5145_v51  ;;  %4632 = vtanh.bf16 %v1473_v39 }
 0x1d3   :  { %v2164_v20 = vsel %vm2163_vm1, %v2162_v26, %v2157_v2  ;;  %v1773_v33 = vpop.xlane.xlu0 %1772  ;;  %v1395_v4 = vadd.f32 %v4200_v28, %v5108_v38  ;;  %v1392_v26 = vadd.f32 %v5108_v38, %v5155_v22 }
 0x1d4   :  { %v2171_v34 = vsel %vm2170_vm2, %v2169_v30, %v2164_v20  ;;  %1898 = vadd.xlane.f32.xlu1 %v1701_v24  ;;  %1896 = vadd.xlane.f32.xlu0 %v1700_v57  ;;  %v1057_v37 = vpop.f32.mrf.mxu0  ;;  %v2190_v9 = vrot.slane %v1773_v33, %v5179_v63  ;;  %v5201_v24 = vsub.s32 %v2207_v60, %v4905_v59  ;;  %v1704_v57 = vunpack.c.l.bf16 %v1604_v7 }
 0x1d5   :  { %v2178_v40 = vsel %vm2177_vm3, %v2176_v23, %v2171_v34  ;;  %v5175_v41 = vpop.xlane.xlu1 %1780  ;;  %v1477_v61 = vpack.c.bf16 %v1395_v4, %v1394_v52  ;;  %v1393_v46 = vadd.f32 %v5108_v38, %v1057_v37  ;;  %v5211_v23 = vsub.s32 %v2214_v14, %v4905_v59 }
 0x1d6   :  { %v2185_v43 = vsel %vm2184_vm4, %v2183_v35, %v2178_v40  ;;  %v4203_v47 = vpop.f32.mrf.mxu0  ;;  %v1261_v33 = vcombine.high %v5055_v54, %v5055_v54  ;;  %v5218_v35 = vsub.s32 %v2221_v16, %v4905_v59 }
 0x1d7   :  { %v4625_v50 = vpop.eup %4624  ;;  %v1775_v58 = vpop.xlane.xlu0 %1774  ;;  %4634 = vtanh.bf16 %v1477_v61  ;;  %v2192_v2 = vsel %vm2191_vm5, %v2190_v9, %v2185_v43  ;;  %v1398_v22 = vadd.f32 %v4203_v47, %v5108_v38  ;;  %v1476_v34 = vpack.c.bf16 %v1393_v46, %v1392_v26 }
 0x1d8   :  { %1908 = vadd.xlane.f32.xlu1 %v1706_v48  ;;  %1916 = vadd.xlane.f32.xlu0 %v1710_v49  ;;  %v1070_v8 = vpop.f32.mrf.mxu0  ;;  %v5194_v13 = vmul.bf16 %v4625_v50, %v4939_v36  ;;  %v2197_v15 = vrot.slane %v1775_v58, %v5183_v53  ;;  %v1705_v47 = vunpack.c.h.bf16 %v1604_v7  ;;  %v2218_v50 = vrot.slane %v5175_v41, %v5211_v23 }
 0x1d9   :  { %v5186_v1 = vpop.xlane.xlu1 %1782  ;;  %v1396_v52 = vadd.f32 %v5108_v38, %v1070_v8  ;;  %v5228_v58 = vrot.slane %v1261_v33, %v4921_v3  ;;  %4636 = vtanh.bf16 %v1476_v34  ;;  %v2228_v9 = vadd.s32 4294967200, %v5098_v19 }
 0x1da   :  { %v4204_v10 = vpop.f32.mrf.mxu0  ;;  %v1712_v32 = vunpack.c.l.bf16 %v5194_v13  ;;  %v2199_v20 = vsel %vm2198_vm6, %v2197_v15, %v2192_v2  ;;  %v2225_v60 = vrot.slane %v5186_v1, %v5218_v35 }
 0x1db   :  { %v1399_v27 = vadd.f32 %v4204_v10, %v5108_v38 }
 0x1dc   :  { %1910 = vadd.xlane.f32.xlu1 %v1707_v11  ;;  %1918 = vadd.xlane.f32.xlu0 %v1711_v12  ;;  %v1073_v18 = vpop.f32.mrf.mxu0 }
 0x1dd   :  { %v4627_v25 = vpop.eup %4626  ;;  %v1777_v29 = vpop.xlane.xlu1 %1776  ;;  %v1479_v39 = vpack.c.bf16 %v1399_v27, %v1398_v22  ;;  %v1397_v40 = vadd.f32 %v5108_v38, %v1073_v18  ;;  %v2242_v22 = vadd.s32 4294967184, %v5098_v19 }
 0x1de   :  { %v4629_v30 = vpop.eup %4628  ;;  %v2204_v28 = vrot.slane %v1777_v29, %v5189_v5  ;;  %v4207_v21 = vpop.f32.mrf.mxu0  ;;  %v1611_v6 = vmul.bf16 %v4627_v25, %v4939_v36  ;;  %v2235_v29 = vadd.s32 4294967192, %v5098_v19 }
 0x1df   :  { %v1606_v48 = vmul.bf16 %v4629_v30, %v4939_v36  ;;  %v4631_v49 = vpop.eup %4630  ;;  %4638 = vtanh.bf16 %v1479_v39  ;;  %v1478_v10 = vpack.c.bf16 %v1397_v40, %v1396_v52  ;;  %v1402_v46 = vadd.f32 %v4207_v21, %v5228_v58 }
 0x1e0   :  { %v2206_v37 = vsel %vm2205_vm7, %v2204_v28, %v2199_v20  ;;  %1904 = vadd.xlane.f32.xlu1 %v1704_v57  ;;  %1920 = vadd.xlane.f32.xlu0 %v1712_v32  ;;  %v1086_v0 = vpop.f32.mrf.mxu0  ;;  %v1718_v54 = vunpack.c.l.bf16 %v1611_v6  ;;  %v1719_v14 = vunpack.c.h.bf16 %v1611_v6  ;;  %v1610_v1 = vmul.bf16 %v4631_v49, %v4939_v36  ;;  %v4633_v16 = vpop.eup %4632 }
 0x1e1   :  { %v1779_v4 = vpop.xlane.xlu1 %1778  ;;  %v1708_v12 = vunpack.c.l.bf16 %v1606_v48  ;;  %4640 = vtanh.bf16 %v1478_v10  ;;  %v1709_v30 = vunpack.c.h.bf16 %v1606_v48  ;;  %v5246_v28 = vsub.s32 %v2228_v9, %v4905_v59 }
 0x1e2   :  { %v2211_v42 = vrot.slane %v1779_v4, %v5201_v24  ;;  %v4208_v43 = vpop.f32.mrf.mxu0  ;;  %v1716_v2 = vunpack.c.l.bf16 %v1610_v1  ;;  %v1609_v32 = vmul.bf16 %v4633_v16, %v4939_v36  ;;  %v1400_v6 = vadd.f32 %v5228_v58, %v1086_v0 }
 0x1e3   :  { %v1403_v38 = vadd.f32 %v4208_v43, %v5228_v58  ;;  %v2249_v20 = vadd.s32 4294967176, %v5098_v19  ;;  %v5256_v4 = vsub.s32 %v2235_v29, %v4905_v59  ;;  %v5263_v48 = vsub.s32 %v2242_v22, %v4905_v59 }
 0x1e4   :  { %v2213_v61 = vsel %vm2212_vm8, %v2211_v42, %v2206_v37  ;;  %1906 = vadd.xlane.f32.xlu1 %v1705_v47  ;;  %1932 = vadd.xlane.f32.xlu0 %v1718_v54  ;;  %v1089_v7 = vpop.f32.mrf.mxu0  ;;  %v1714_v43 = vunpack.c.l.bf16 %v1609_v32  ;;  %v1717_v47 = vunpack.c.h.bf16 %v1610_v1 }
 0x1e5   :  { %v2220_v41 = vsel %vm2219_vm9, %v2218_v50, %v2213_v61  ;;  %v5236_v8 = vpop.xlane.xlu1 %1788  ;;  %v1481_v25 = vpack.c.bf16 %v1403_v38, %v1402_v46  ;;  %v1401_v26 = vadd.f32 %v5228_v58, %v1089_v7  ;;  %v4635_v21 = vpop.eup %4634  ;;  %v5267_v50 = vsub.s32 %v2249_v20, %v4905_v59 }
 0x1e6   :  { %v4211_v11 = vpop.f32.mrf.mxu0  ;;  %v2227_v15 = vsel %vm2226_vm10, %v2225_v60, %v2220_v41  ;;  %v1613_v54 = vmul.bf16 %v4635_v21, %v4939_v36 }
 0x1e7   :  { %4642 = vtanh.bf16 %v1481_v25  ;;  %v1480_v34 = vpack.c.bf16 %v1401_v26, %v1400_v6  ;;  %v1406_v49 = vadd.f32 %v4211_v11, %v5228_v58  ;;  %v4637_v10 = vpop.eup %4636  ;;  %v1715_v11 = vunpack.c.h.bf16 %v1609_v32 }
 0x1e8   :  { %1912 = vadd.xlane.f32.xlu1 %v1708_v12  ;;  %1934 = vadd.xlane.f32.xlu0 %v1719_v14  ;;  %v5241_v18 = vpop.f32.mrf.mxu0  ;;  %v1722_v59 = vunpack.c.l.bf16 %v1613_v54  ;;  %v2246_v14 = vrot.slane %v5236_v8, %v5263_v48  ;;  %v1713_v8 = vunpack.c.h.bf16 %v5194_v13 }
 0x1e9   :  { %v1791_v27 = vpop.xlane.xlu1 %1790  ;;  %4644 = vtanh.bf16 %v1480_v34  ;;  %v1404_v6 = vadd.f32 %v5228_v58, %v5241_v18 }
 0x1ea   :  { %v4212_v57 = vpop.f32.mrf.mxu0  ;;  %v2253_v1 = vrot.slane %v1791_v27, %v5267_v50 }
 0x1eb   :  { %v1407_v37 = vadd.f32 %v4212_v57, %v5228_v58 }
 0x1ec   :  { %1914 = vadd.xlane.f32.xlu1 %v1709_v30  ;;  %1928 = vadd.xlane.f32.xlu0 %v1716_v2  ;;  %v1105_v33 = vpop.f32.mrf.mxu0  ;;  %v1723_v30 = vunpack.c.h.bf16 %v1613_v54  ;;  %v1612_v2 = vmul.bf16 %v4637_v10, %v4939_v36 }
 0x1ed   :  { %v1785_v39 = vpop.xlane.xlu1 %1784  ;;  %v5253_v40 = vpop.xlane.xlu0 %1800  ;;  %v1483_v61 = vpack.c.bf16 %v1407_v37, %v1406_v49  ;;  %v1405_v46 = vadd.f32 %v5228_v58, %v1105_v33 }
 0x1ee   :  { %v2232_v0 = vrot.slane %v1785_v39, %v5246_v28  ;;  %v5259_v42 = vpop.f32.mrf.mxu0  ;;  %v4639_v12 = vpop.eup %4638  ;;  %v1720_v37 = vunpack.c.l.bf16 %v1612_v2 }
 0x1ef   :  { %4646 = vtanh.bf16 %v1483_v61  ;;  %v1615_v32 = vmul.bf16 %v4639_v12, %v4939_v36  ;;  %v4641_v21 = vpop.eup %4640  ;;  %v1482_v20 = vpack.c.bf16 %v1405_v46, %v1404_v6  ;;  %v1410_v12 = vadd.f32 %v5259_v42, %v5228_v58 }
 0x1f0   :  { %v2234_v52 = vsel %vm2233_vm11, %v2232_v0, %v2227_v15  ;;  %1924 = vadd.xlane.f32.xlu1 %v1714_v43  ;;  %1930 = vadd.xlane.f32.xlu0 %v1717_v47  ;;  %v5270_v60 = vpop.f32.mrf.mxu0  ;;  %v5302_v0 = vmul.bf16 %v4641_v21, %v4939_v36  ;;  %v1263_v47 = vcombine.high %v5094_v17, %v5094_v17 }
 0x1f1   :  { %v1787_v7 = vpop.xlane.xlu1 %1786  ;;  %v5272_v9 = vpop.xlane.xlu0 %1802  ;;  %v1726_v39 = vunpack.c.l.bf16 %v1615_v32  ;;  %4648 = vtanh.bf16 %v1482_v20  ;;  %v1408_v46 = vadd.f32 %v5228_v58, %v5270_v60 }
 0x1f2   :  { %v2239_v41 = vrot.slane %v1787_v7, %v5256_v4  ;;  %v4216_v38 = vpop.f32.mrf.mxu0  ;;  %v2283_v60 = vrot.slane %v5272_v9, %v5145_v51 }
 0x1f3   :  { %v1411_v54 = vadd.f32 %v4216_v38, %v5228_v58  ;;  %v5318_v38 = vrot.slane %v1263_v47, %v4921_v3 }
 0x1f4   :  { %v2241_v15 = vsel %vm2240_vm12, %v2239_v41, %v2234_v52  ;;  %1926 = vadd.xlane.f32.xlu1 %v1715_v11  ;;  %1940 = vadd.xlane.f32.xlu0 %v1722_v59  ;;  %v5279_v16 = vpop.f32.mrf.mxu0  ;;  %v1721_v41 = vunpack.c.h.bf16 %v1612_v2  ;;  %v1725_v11 = vunpack.c.h.bf16 %v5302_v0  ;;  %v1727_v2 = vunpack.c.h.bf16 %v1615_v32 }
 0x1f5   :  { %v2248_v25 = vsel %vm2247_vm13, %v2246_v14, %v2241_v15  ;;  %v5283_v26 = vpop.xlane.xlu1 %1796  ;;  %v5285_v29 = vpop.xlane.xlu0 %1812 }
 0x1f6   :  { %v5289_v57 = vsel %vm2254_vm14, %v2253_v1, %v2248_v25  ;;  %v5291_v27 = vpop.f32.mrf.mxu0  ;;  %v4643_v43 = vpop.eup %4642  ;;  %v2278_v1 = vrot.slane %v5253_v40, %v5139_v55  ;;  %v1485_v25 = vpack.c.bf16 %v1411_v54, %v1410_v12  ;;  %v2268_v20 = vrot.slane %v5283_v26, %v5125_v44 }
 0x1f7   :  { %v5313_v59 = vmul.bf16 %v4643_v43, %v4939_v36  ;;  %v4645_v17 = vpop.eup %4644  ;;  %v1724_v54 = vunpack.c.l.bf16 %v5302_v0 }
 0x1f8   :  { %1922 = vadd.xlane.f32.xlu1 %v1713_v8  ;;  %1942 = vadd.xlane.f32.xlu0 %v1723_v30  ;;  %v1134_v22 = vpop.f32.mrf.mxu0  ;;  %v5330_v40 = vmul.bf16 %v4645_v17, %v4939_v36 }
 0x1f9   :  { %v1799_v33 = vpop.xlane.xlu1 %1798  ;;  %v5297_v13 = vpop.xlane.xlu0 %1814  ;;  %v1412_v49 = vadd.f32 %v5228_v58, %v1134_v22  ;;  %v1731_v6 = vunpack.c.h.bf16 %v5313_v59 }
 0x1fa   :  { %v5299_v34 = vpop.f32.mrf.mxu0  ;;  %v2273_v43 = vrot.slane %v1799_v33, %v5128_v45 }
 0x1fc   :  { %1936 = vadd.xlane.f32.xlu0 %v1720_v37  ;;  %1948 = vadd.xlane.f32.xlu1 %v1726_v39  ;;  %v1137_v18 = vpop.f32.mrf.mxu0  ;;  %v1409_v39 = vadd.f32 %v5228_v58, %v5279_v16 }
 0x1fd   :  { %v1413_v52 = vadd.f32 %v5228_v58, %v1137_v18  ;;  %v1793_v61 = vpop.xlane.xlu1 %1792  ;;  %v5309_v7 = vpop.xlane.xlu0 %1808 }
 0x1fe   :  { %v4223_v10 = vpop.f32.mrf.mxu0  ;;  %v2259_v42 = vrot.slane %v1793_v61, %v5134_v31  ;;  %v4647_v22 = vpop.eup %4646  ;;  %v1484_v12 = vpack.c.bf16 %v1409_v39, %v1408_v46  ;;  %v1730_v46 = vunpack.c.l.bf16 %v5313_v59 }
 0x1ff   :  { %v1486_v14 = vpack.c.bf16 %v1413_v52, %v1412_v49  ;;  %v1418_v37 = vadd.f32 %v4223_v10, %v5318_v38 }
 0x200   :  { %1938 = vadd.xlane.f32.xlu0 %v1721_v41  ;;  %1946 = vadd.xlane.f32.xlu1 %v1725_v11  ;;  %v1150_v15 = vpop.f32.mrf.mxu0  ;;  %v1729_v41 = vunpack.c.h.bf16 %v5330_v40  ;;  %v1619_v11 = vmul.bf16 %v4647_v22, %v4939_v36 }
 0x201   :  { %4650 = vtanh.bf16 %v1486_v14  ;;  %v1795_v8 = vpop.xlane.xlu1 %1794  ;;  %v5324_v30 = vpop.xlane.xlu0 %1810  ;;  %v1416_v0 = vadd.f32 %v5318_v38, %v1150_v15  ;;  %v2308_v15 = vrot.slane %v5285_v29, %v5211_v23  ;;  %v1415_v29 = vadd.f32 %v5299_v34, %v5228_v58 }
 0x202   :  { %v2263_v3 = vrot.slane %v1795_v8, %v5142_v56  ;;  %v4224_v21 = vpop.f32.mrf.mxu0  ;;  %4652 = vtanh.bf16 %v1485_v25  ;;  %v1734_v22 = vunpack.c.l.bf16 %v1619_v11  ;;  %v2303_v59 = vrot.slane %v5324_v30, %v5201_v24 }
 0x203   :  { %v1419_v32 = vadd.f32 %v4224_v21, %v5318_v38  ;;  %v1735_v34 = vunpack.c.h.bf16 %v1619_v11 }
 0x204   :  { %v2264_v47 = vsel %vm2156_vm0, %v2263_v3, %v2259_v42  ;;  %1950 = vadd.xlane.f32.xlu0 %v1727_v2  ;;  %1958 = vadd.xlane.f32.xlu1 %v1731_v6  ;;  %v1153_v18 = vpop.f32.mrf.mxu0 }
 0x205   :  { %v2269_v9 = vsel %vm2163_vm1, %v2268_v20, %v2264_v47  ;;  %v1489_v26 = vpack.c.bf16 %v1419_v32, %v1418_v37  ;;  %v1417_v49 = vadd.f32 %v5318_v38, %v1153_v18  ;;  %v1805_v52 = vpop.xlane.xlu1 %1804  ;;  %v5345_v61 = vpop.xlane.xlu0 %1820  ;;  %v1414_v20 = vadd.f32 %v5291_v27, %v5228_v58 }
 0x206   :  { %v2274_v16 = vsel %vm2170_vm2, %v2273_v43, %v2269_v9  ;;  %v2288_v33 = vrot.slane %v1805_v52, %v5179_v63  ;;  %v4227_v10 = vpop.f32.mrf.mxu0  ;;  %v2313_v37 = vrot.slane %v5297_v13, %v5218_v35  ;;  %v2298_v32 = vrot.slane %v5309_v7, %v5189_v5 }
 0x207   :  { %4654 = vtanh.bf16 %v1489_v26  ;;  %v2279_v17 = vsel %vm2177_vm3, %v2278_v1, %v2274_v16  ;;  %v1488_v8 = vpack.c.bf16 %v1417_v49, %v1416_v0  ;;  %v1422_v42 = vadd.f32 %v4227_v10, %v5318_v38 }
 0x208   :  { %v2284_v14 = vsel %vm2184_vm4, %v2283_v60, %v2279_v17  ;;  %1944 = vadd.xlane.f32.xlu0 %v1724_v54  ;;  %1954 = vadd.xlane.f32.xlu1 %v1729_v41  ;;  %v1166_v25 = vpop.f32.mrf.mxu0  ;;  %v4649_v60 = vpop.eup %4648  ;;  %4656 = vtanh.bf16 %v1484_v12  ;;  %v1728_v54 = vunpack.c.l.bf16 %v5330_v40  ;;  %v1487_v16 = vpack.c.bf16 %v1415_v29, %v1414_v20 }
 0x209   :  { %v2289_v2 = vsel %vm2191_vm5, %v2288_v33, %v2284_v14  ;;  %v1807_v3 = vpop.xlane.xlu1 %1806  ;;  %v5356_v21 = vpop.xlane.xlu0 %1822  ;;  %4658 = vtanh.bf16 %v1488_v8  ;;  %v1618_v30 = vmul.bf16 %v4649_v60, %v4939_v36  ;;  %v1420_v40 = vadd.f32 %v5318_v38, %v1166_v25 }
 0x20a   :  { %v2293_v6 = vrot.slane %v1807_v3, %v5183_v53  ;;  %v4228_v1 = vpop.f32.mrf.mxu0 }
 0x20b   :  { %v1423_v39 = vadd.f32 %v4228_v1, %v5318_v38  ;;  %v1732_v8 = vunpack.c.l.bf16 %v1618_v30 }
 0x20c   :  { %v2294_v43 = vsel %vm2198_vm6, %v2293_v6, %v2289_v2  ;;  %1956 = vadd.xlane.f32.xlu0 %v1730_v46  ;;  %1964 = vadd.xlane.f32.xlu1 %v1734_v22  ;;  %v1169_v27 = vpop.f32.mrf.mxu0  ;;  %v2333_v6 = vrot.slane %v5356_v21, %v5267_v50 }
 0x20d   :  { %v2299_v13 = vsel %vm2205_vm7, %v2298_v32, %v2294_v43  ;;  %v1491_v47 = vpack.c.bf16 %v1423_v39, %v1422_v42  ;;  %v1817_v18 = vpop.xlane.xlu0 %1816  ;;  %v5375_v7 = vpop.xlane.xlu1 %1830  ;;  %v1421_v0 = vadd.f32 %v5318_v38, %v1169_v27  ;;  %v1733_v32 = vunpack.c.h.bf16 %v1618_v30 }
 0x20e   :  { %v2304_v9 = vsel %vm2212_vm8, %v2303_v59, %v2299_v13  ;;  %v2318_v58 = vrot.slane %v1817_v18, %v5246_v28  ;;  %v4231_v26 = vpop.f32.mrf.mxu0 }
 0x20f   :  { %v4651_v49 = vpop.eup %4650  ;;  %v2309_v52 = vsel %vm2219_vm9, %v2308_v15, %v2304_v9  ;;  %4660 = vtanh.bf16 %v1491_v47  ;;  %v2328_v15 = vrot.slane %v5345_v61, %v5263_v48  ;;  %v1490_v22 = vpack.c.bf16 %v1421_v0, %v1420_v40 }
 0x210   :  { %v2314_v33 = vsel %vm2226_vm10, %v2313_v37, %v2309_v52  ;;  %1952 = vadd.xlane.f32.xlu0 %v1728_v54  ;;  %1966 = vadd.xlane.f32.xlu1 %v1735_v34  ;;  %v1622_v10 = vmul.bf16 %v4651_v49, %v4939_v36  ;;  %v1182_v41 = vpop.f32.mrf.mxu0  ;;  %v4653_v3 = vpop.eup %4652  ;;  %4662 = vtanh.bf16 %v1487_v16  ;;  %v1426_v27 = vadd.f32 %v4231_v26, %v5318_v38 }
 0x211   :  { %v2319_v11 = vsel %vm2233_vm11, %v2318_v58, %v2314_v33  ;;  %v1819_v17 = vpop.xlane.xlu0 %1818  ;;  %v1827_v12 = vpop.xlane.xlu1 %1826  ;;  %v1621_v21 = vmul.bf16 %v4653_v3, %v4939_v36  ;;  %4664 = vtanh.bf16 %v1490_v22  ;;  %v2352_v26 = vrot.slane %v5375_v7, %v5128_v45 }
 0x212   :  { %v2323_v14 = vrot.slane %v1819_v17, %v5256_v4  ;;  %v1740_v2 = vunpack.c.l.bf16 %v1622_v10  ;;  %v4232_v42 = vpop.f32.mrf.mxu0  ;;  %v1741_v39 = vunpack.c.h.bf16 %v1622_v10  ;;  %v2342_v58 = vrot.slane %v1827_v12, %v5142_v56 }
 0x213   :  { %v1427_v13 = vadd.f32 %v4232_v42, %v5318_v38  ;;  %v1738_v30 = vunpack.c.l.bf16 %v1621_v21  ;;  %v1424_v10 = vadd.f32 %v5318_v38, %v1182_v41 }
 0x214   :  { %v2324_v25 = vsel %vm2240_vm12, %v2323_v14, %v2319_v11  ;;  %1960 = vadd.xlane.f32.xlu1 %v1732_v8  ;;  %1976 = vadd.xlane.f32.xlu0 %v1740_v2  ;;  %v1185_v1 = vpop.f32.mrf.mxu0  ;;  %v1739_v11 = vunpack.c.h.bf16 %v1621_v21 }
 0x215   :  { %v4655_v46 = vpop.eup %4654  ;;  %v2329_v60 = vsel %vm2247_vm13, %v2328_v15, %v2324_v25  ;;  %v1829_v20 = vpop.xlane.xlu0 %1828  ;;  %v1493_v0 = vpack.c.bf16 %v1427_v13, %v1426_v27  ;;  %v1425_v8 = vadd.f32 %v5318_v38, %v1185_v1 }
 0x216   :  { %v5394_v37 = vpop.xlane.xlu1 %1838  ;;  %v2334_v61 = vsel %vm2254_vm14, %v2333_v6, %v2329_v60  ;;  %v1625_v29 = vmul.bf16 %v4655_v46, %v4939_v36  ;;  %v4235_v59 = vpop.f32.mrf.mxu0  ;;  %v2347_v16 = vrot.slane %v1829_v20, %v5125_v44 }
 0x217   :  { %v5401_v43 = vsel %vm5760_vm15, %v2334_v61, %v5289_v57  ;;  %v4657_v9 = vpop.eup %4656  ;;  %4666 = vtanh.bf16 %v1493_v0  ;;  %v1492_v60 = vpack.c.bf16 %v1425_v8, %v1424_v10  ;;  %v1430_v1 = vadd.f32 %v4235_v59, %v5318_v38 }
 0x218   :  { %1962 = vadd.xlane.f32.xlu1 %v1733_v32  ;;  %1978 = vadd.xlane.f32.xlu0 %v1741_v39  ;;  %v1198_v47 = vpop.f32.mrf.mxu0  ;;  %v1746_v49 = vunpack.c.l.bf16 %v1625_v29  ;;  %v4659_v57 = vpop.eup %4658  ;;  %v1747_v41 = vunpack.c.h.bf16 %v1625_v29  ;;  %v1620_v15 = vmul.bf16 %v4657_v9, %v4939_v36  ;;  %vm5761_vm15 = vcmask 1042434  }
 0x219   :  { %v1825_v18 = vpop.xlane.xlu0 %1824  ;;  %v1428_v33 = vadd.f32 %v5318_v38, %v1198_v47  ;;  %v1624_v6 = vmul.bf16 %v4659_v57, %v4939_v36 }
 0x21a   :  { %v1833_v54 = vpop.xlane.xlu1 %1832  ;;  %v2338_v34 = vrot.slane %v1825_v18, %v5134_v31  ;;  %v4236_v52 = vpop.f32.mrf.mxu0  ;;  %v1736_v21 = vunpack.c.l.bf16 %v1620_v15  ;;  %v2372_v18 = vrot.slane %v5394_v37, %v5183_v53 }
 0x21b   :  { %v2357_v14 = vrot.slane %v1833_v54, %v5139_v55  ;;  %v1431_v61 = vadd.f32 %v4236_v52, %v5318_v38  ;;  %v1745_v29 = vunpack.c.h.bf16 %v1624_v6 }
 0x21c   :  { %v2343_v40 = vsel %vm2156_vm0, %v2342_v58, %v2338_v34  ;;  %1972 = vadd.xlane.f32.xlu1 %v1738_v30  ;;  %1988 = vadd.xlane.f32.xlu0 %v1746_v49  ;;  %v1201_v17 = vpop.f32.mrf.mxu0  ;;  %v1737_v34 = vunpack.c.h.bf16 %v1620_v15 }
 0x21d   :  { %v2348_v12 = vsel %vm2163_vm1, %v2347_v16, %v2343_v40  ;;  %v1837_v7 = vpop.xlane.xlu0 %1836  ;;  %v1429_v42 = vadd.f32 %v5318_v38, %v1201_v17  ;;  %v4661_v25 = vpop.eup %4660  ;;  %v1495_v59 = vpack.c.bf16 %v1431_v61, %v1430_v1 }
 0x21e   :  { %v1845_v2 = vpop.xlane.xlu1 %1844  ;;  %v2353_v3 = vsel %vm2170_vm2, %v2352_v26, %v2348_v12  ;;  %v1627_v27 = vmul.bf16 %v4661_v25, %v4939_v36  ;;  %v4663_v13 = vpop.eup %4662  ;;  %v2367_v47 = vrot.slane %v1837_v7, %v5179_v63 }
 0x21f   :  { %v2358_v46 = vsel %vm2177_vm3, %v2357_v14, %v2353_v3  ;;  %v1494_v22 = vpack.c.bf16 %v1429_v42, %v1428_v33  ;;  %v1623_v57 = vmul.bf16 %v4663_v13, %v4939_v36  ;;  %v4665_v37 = vpop.eup %4664  ;;  %v2387_v17 = vrot.slane %v1845_v2, %v5211_v23 }
 0x220   :  { %1974 = vadd.xlane.f32.xlu1 %v1739_v11  ;;  %1990 = vadd.xlane.f32.xlu0 %v1747_v41  ;;  %v1750_v52 = vunpack.c.l.bf16 %v1627_v27  ;;  %v1751_v0 = vunpack.c.h.bf16 %v1627_v27  ;;  %v1626_v11 = vmul.bf16 %v4665_v37, %v4939_v36  ;;  %v1744_v3 = vunpack.c.l.bf16 %v1624_v6 }
 0x221   :  { %v1835_v20 = vpop.xlane.xlu0 %1834  ;;  %4668 = vtanh.bf16 %v1494_v22  ;;  %v1742_v40 = vunpack.c.l.bf16 %v1623_v57 }
 0x222   :  { %v1847_v32 = vpop.xlane.xlu1 %1846  ;;  %v2362_v39 = vrot.slane %v1835_v20, %v5145_v51  ;;  %4670 = vtanh.bf16 %v1492_v60  ;;  %v1748_v41 = vunpack.c.l.bf16 %v1626_v11  ;;  %v1743_v60 = vunpack.c.h.bf16 %v1623_v57 }
 0x223   :  { %4672 = vtanh.bf16 %v1495_v59  ;;  %v2392_v12 = vrot.slane %v1847_v32, %v5218_v35  ;;  %v1749_v1 = vunpack.c.h.bf16 %v1626_v11 }
 0x224   :  { %v2363_v54 = vsel %vm2184_vm4, %v2362_v39, %v2358_v46  ;;  %1968 = vadd.xlane.f32.xlu1 %v1736_v21  ;;  %1986 = vadd.xlane.f32.xlu0 %v1745_v29 }
 0x225   :  { %v2368_v38 = vsel %vm2191_vm5, %v2367_v47, %v2363_v54  ;;  %v5430_v58 = vpop.xlane.xlu0 %1860  ;;  %v4667_v25 = vpop.eup %4666 }
 0x226   :  { %v1841_v9 = vpop.xlane.xlu1 %1840  ;;  %v2373_v30 = vsel %vm2198_vm6, %v2372_v18, %v2368_v38  ;;  %v1629_v20 = vmul.bf16 %v4667_v25, %v4939_v36 }
 0x227   :  { %v2377_v49 = vrot.slane %v1841_v9, %v5189_v5 }
 0x228   :  { %1970 = vadd.xlane.f32.xlu1 %v1737_v34  ;;  %1996 = vadd.xlane.f32.xlu0 %v1750_v52  ;;  %v1755_v29 = vunpack.c.h.bf16 %v1629_v20  ;;  %v1754_v27 = vunpack.c.l.bf16 %v1629_v20 }
 0x229   :  { %v2378_v26 = vsel %vm2205_vm7, %v2377_v49, %v2373_v30  ;;  %v5436_v33 = vpop.xlane.xlu0 %1862 }
 0x22a   :  { %v1843_v16 = vpop.xlane.xlu1 %1842 }
 0x22b   :  { %v2382_v10 = vrot.slane %v1843_v16, %v5201_v24 }
 0x22c   :  { %1980 = vadd.xlane.f32.xlu1 %v1742_v40  ;;  %1998 = vadd.xlane.f32.xlu0 %v1751_v0 }
 0x22d   :  { %v2383_v14 = vsel %vm2212_vm8, %v2382_v10, %v2378_v26  ;;  %v1859_v42 = vpop.xlane.xlu0 %1858 }
 0x22e   :  { %v2388_v8 = vsel %vm2219_vm9, %v2387_v17, %v2383_v14  ;;  %v1853_v7 = vpop.xlane.xlu1 %1852  ;;  %v2421_v40 = vrot.slane %v1859_v42, %v5142_v56  ;;  %v2426_v17 = vrot.slane %v5430_v58, %v5125_v44  ;;  %v2431_v14 = vrot.slane %v5436_v33, %v5128_v45 }
 0x22f   :  { %v2393_v15 = vsel %vm2226_vm10, %v2392_v12, %v2388_v8  ;;  %v4669_v46 = vpop.eup %4668  ;;  %v2407_v49 = vrot.slane %v1853_v7, %v5263_v48 }
 0x230   :  { %1984 = vadd.xlane.f32.xlu1 %v1744_v3  ;;  %1992 = vadd.xlane.f32.xlu0 %v1748_v41  ;;  %v4671_v32 = vpop.eup %4670  ;;  %v1630_v61 = vmul.bf16 %v4669_v46, %v4939_v36 }
 0x231   :  { %v5445_v2 = vpop.xlane.xlu0 %1868  ;;  %v1628_v13 = vmul.bf16 %v4671_v32, %v4939_v36  ;;  %v4673_v47 = vpop.eup %4672 }
 0x232   :  { %v1855_v22 = vpop.xlane.xlu1 %1854  ;;  %v1756_v54 = vunpack.c.l.bf16 %v1630_v61  ;;  %v1631_v30 = vmul.bf16 %v4673_v47, %v4939_v36  ;;  %v1757_v25 = vunpack.c.h.bf16 %v1630_v61 }
 0x233   :  { %v1752_v34 = vunpack.c.l.bf16 %v1628_v13  ;;  %v2412_v52 = vrot.slane %v1855_v22, %v5267_v50  ;;  %v1753_v10 = vunpack.c.h.bf16 %v1628_v13 }
 0x234   :  { %1982 = vadd.xlane.f32.xlu1 %v1743_v60  ;;  %1994 = vadd.xlane.f32.xlu0 %v1749_v1  ;;  %v1759_v11 = vunpack.c.h.bf16 %v1631_v30  ;;  %v1758_v22 = vunpack.c.l.bf16 %v1631_v30  ;;  %v2446_v60 = vrot.slane %v5445_v2, %v5179_v63 }
 0x235   :  { %v1871_v39 = vpop.xlane.xlu0 %1870 }
 0x236   :  { %v1849_v6 = vpop.xlane.xlu1 %1848  ;;  %v2451_v1 = vrot.slane %v1871_v39, %v5183_v53 }
 0x237   :  { %v2397_v21 = vrot.slane %v1849_v6, %v5246_v28 }
 0x238   :  { %2006 = vadd.xlane.f32.xlu1 %v1755_v29  ;;  %2004 = vadd.xlane.f32.xlu0 %v1754_v27 }
 0x239   :  { %v2398_v18 = vsel %vm2233_vm11, %v2397_v21, %v2393_v15  ;;  %v1877_v59 = vpop.xlane.xlu0 %1876 }
 0x23a   :  { %v1851_v38 = vpop.xlane.xlu1 %1850  ;;  %v2466_v13 = vrot.slane %v1877_v59, %v5211_v23 }
 0x23b   :  { %v2402_v9 = vrot.slane %v1851_v38, %v5256_v4 }
 0x23c   :  { %2000 = vadd.xlane.f32.xlu0 %v1752_v34  ;;  %2008 = vadd.xlane.f32.xlu1 %v1756_v54 }
 0x23d   :  { %v2403_v57 = vsel %vm2240_vm12, %v2402_v9, %v2398_v18  ;;  %v1879_v16 = vpop.xlane.xlu0 %1878 }
 0x23e   :  { %v2408_v37 = vsel %vm2247_vm13, %v2407_v49, %v2403_v57  ;;  %v1857_v26 = vpop.xlane.xlu1 %1856  ;;  %v2471_v2 = vrot.slane %v1879_v16, %v5218_v35 }
 0x23f   :  { %v2413_v0 = vsel %vm2254_vm14, %v2412_v52, %v2408_v37  ;;  %v2417_v36 = vrot.slane %v1857_v26, %v5134_v31 }
 0x240   :  { %v2812_v12 = vsel %vm5761_vm15, %v2413_v0, %v5401_v43  ;;  %2002 = vadd.xlane.f32.xlu0 %v1753_v10  ;;  %2014 = vadd.xlane.f32.xlu1 %v1759_v11  ;;  %vm5762_vm15 = vcmask 1043459  }
 0x241   :  { %v2422_v8 = vsel %vm2156_vm0, %v2421_v40, %v2417_v36  ;;  %v1873_v3 = vpop.xlane.xlu0 %1872 }
 0x242   :  { %v2427_v7 = vsel %vm2163_vm1, %v2426_v17, %v2422_v8  ;;  %v1865_v42 = vpop.xlane.xlu1 %1864  ;;  %v2456_v32 = vrot.slane %v1873_v3, %v5189_v5 }
 0x243   :  { %v2432_v41 = vsel %vm2170_vm2, %v2431_v14, %v2427_v7  ;;  %v2436_v15 = vrot.slane %v1865_v42, %v5139_v55 }
 0x244   :  { %2010 = vadd.xlane.f32.xlu0 %v1757_v25 }
 0x245   :  { %v2437_v58 = vsel %vm2177_vm3, %v2436_v15, %v2432_v41  ;;  %v1875_v46 = vpop.xlane.xlu0 %1874 }
 0x246   :  { %v1867_v43 = vpop.xlane.xlu1 %1866  ;;  %v2461_v27 = vrot.slane %v1875_v46, %v5201_v24 }
 0x247   :  { %v2441_v33 = vrot.slane %v1867_v43, %v5145_v51 }
 0x248   :  { %2012 = vadd.xlane.f32.xlu0 %v1758_v22 }
 0x249   :  { %v2442_v20 = vsel %vm2184_vm4, %v2441_v33, %v2437_v58  ;;  %v1885_v21 = vpop.xlane.xlu0 %1884 }
 0x24a   :  { %v2447_v61 = vsel %vm2191_vm5, %v2446_v60, %v2442_v20  ;;  %v1887_v6 = vpop.xlane.xlu1 %1886  ;;  %v2486_v57 = vrot.slane %v1885_v21, %v5263_v48 }
 0x24b   :  { %v2452_v29 = vsel %vm2198_vm6, %v2451_v1, %v2447_v61  ;;  %v2491_v37 = vrot.slane %v1887_v6, %v5267_v50 }
 0x24c   :  { %v2457_v47 = vsel %vm2205_vm7, %v2456_v32, %v2452_v29 }
 0x24d   :  { %v2462_v39 = vsel %vm2212_vm8, %v2461_v27, %v2457_v47  ;;  %v1881_v54 = vpop.xlane.xlu0 %1880 }
 0x24e   :  { %v2467_v18 = vsel %vm2219_vm9, %v2466_v13, %v2462_v39  ;;  %v1893_v38 = vpop.xlane.xlu1 %1892  ;;  %v2476_v34 = vrot.slane %v1881_v54, %v5246_v28 }
 0x24f   :  { %v2472_v9 = vsel %vm2226_vm10, %v2471_v2, %v2467_v18  ;;  %v2505_v7 = vrot.slane %v1893_v38, %v5125_v44 }
 0x250   :  { %v2477_v30 = vsel %vm2233_vm11, %v2476_v34, %v2472_v9 }
 0x251   :  { %v1883_v49 = vpop.xlane.xlu0 %1882 }
 0x252   :  { %v1889_v52 = vpop.xlane.xlu1 %1888  ;;  %v2481_v59 = vrot.slane %v1883_v49, %v5256_v4 }
 0x253   :  { %v2496_v14 = vrot.slane %v1889_v52, %v5134_v31 }
 0x254   :  { %v2482_v26 = vsel %vm2240_vm12, %v2481_v59, %v2477_v30 }
 0x255   :  { %v2487_v16 = vsel %vm2247_vm13, %v2486_v57, %v2482_v26  ;;  %v1895_v10 = vpop.xlane.xlu0 %1894 }
 0x256   :  { %v1901_v40 = vpop.xlane.xlu1 %1900  ;;  %v2492_v0 = vsel %vm2254_vm14, %v2491_v37, %v2487_v16  ;;  %v2510_v42 = vrot.slane %v1895_v10, %v5128_v45 }
 0x257   :  { %v2814_v36 = vsel %vm5762_vm15, %v2492_v0, %v2812_v12  ;;  %v2525_v46 = vrot.slane %v1901_v40, %v5179_v63  ;;  %vm5763_vm15 = vcmask 1044484  }
 0x259   :  { %v1891_v11 = vpop.xlane.xlu0 %1890 }
 0x25a   :  { %v1903_v17 = vpop.xlane.xlu1 %1902  ;;  %v2500_v8 = vrot.slane %v1891_v11, %v5142_v56 }
 0x25b   :  { %v2530_v22 = vrot.slane %v1903_v17, %v5183_v53 }
 0x25c   :  { %v2501_v3 = vsel %vm2156_vm0, %v2500_v8, %v2496_v14 }
 0x25d   :  { %v2506_v41 = vsel %vm2163_vm1, %v2505_v7, %v2501_v3  ;;  %v1897_v25 = vpop.xlane.xlu0 %1896 }
 0x25e   :  { %v1899_v15 = vpop.xlane.xlu1 %1898  ;;  %v2511_v12 = vsel %vm2170_vm2, %v2510_v42, %v2506_v41  ;;  %v2515_v43 = vrot.slane %v1897_v25, %v5139_v55 }
 0x25f   :  { %v2520_v58 = vrot.slane %v1899_v15, %v5145_v51 }
 0x260   :  { %v2516_v33 = vsel %vm2177_vm3, %v2515_v43, %v2511_v12 }
 0x261   :  { %v2521_v60 = vsel %vm2184_vm4, %v2520_v58, %v2516_v33  ;;  %v1917_v20 = vpop.xlane.xlu0 %1916 }
 0x262   :  { %v1909_v1 = vpop.xlane.xlu1 %1908  ;;  %v2526_v32 = vsel %vm2191_vm5, %v2525_v46, %v2521_v60  ;;  %v2565_v10 = vrot.slane %v1917_v20, %v5263_v48 }
 0x263   :  { %v2531_v61 = vsel %vm2198_vm6, %v2530_v22, %v2526_v32  ;;  %v2545_v54 = vrot.slane %v1909_v1, %v5211_v23 }
 0x265   :  { %v1919_v21 = vpop.xlane.xlu0 %1918 }
 0x266   :  { %v1911_v6 = vpop.xlane.xlu1 %1910  ;;  %v2570_v40 = vrot.slane %v1919_v21, %v5267_v50 }
 0x267   :  { %v2550_v38 = vrot.slane %v1911_v6, %v5218_v35 }
 0x269   :  { %v1921_v27 = vpop.xlane.xlu0 %1920 }
 0x26a   :  { %v1905_v29 = vpop.xlane.xlu1 %1904  ;;  %v2575_v25 = vrot.slane %v1921_v27, %v5134_v31 }
 0x26b   :  { %v2535_v13 = vrot.slane %v1905_v29, %v5189_v5 }
 0x26d   :  { %v2536_v47 = vsel %vm2205_vm7, %v2535_v13, %v2531_v61  ;;  %v1933_v39 = vpop.xlane.xlu0 %1932 }
 0x26e   :  { %v1907_v2 = vpop.xlane.xlu1 %1906  ;;  %v2604_v32 = vrot.slane %v1933_v39, %v5179_v63 }
 0x26f   :  { %v2540_v18 = vrot.slane %v1907_v2, %v5201_v24 }
 0x271   :  { %v2541_v9 = vsel %vm2212_vm8, %v2540_v18, %v2536_v47  ;;  %v1935_v49 = vpop.xlane.xlu0 %1934 }
 0x272   :  { %v2546_v34 = vsel %vm2219_vm9, %v2545_v54, %v2541_v9  ;;  %v1913_v30 = vpop.xlane.xlu1 %1912  ;;  %v2609_v6 = vrot.slane %v1935_v49, %v5183_v53 }
 0x273   :  { %v2551_v52 = vsel %vm2226_vm10, %v2550_v38, %v2546_v34  ;;  %v2555_v59 = vrot.slane %v1913_v30, %v5246_v28 }
 0x275   :  { %v2556_v57 = vsel %vm2233_vm11, %v2555_v59, %v2551_v52  ;;  %v1929_v26 = vpop.xlane.xlu0 %1928 }
 0x276   :  { %v1915_v37 = vpop.xlane.xlu1 %1914  ;;  %v2594_v33 = vrot.slane %v1929_v26, %v5139_v55 }
 0x277   :  { %v2560_v16 = vrot.slane %v1915_v37, %v5256_v4 }
 0x279   :  { %v2561_v0 = vsel %vm2240_vm12, %v2560_v16, %v2556_v57  ;;  %v1931_v14 = vpop.xlane.xlu0 %1930 }
 0x27a   :  { %v2566_v11 = vsel %vm2247_vm13, %v2565_v10, %v2561_v0  ;;  %v1925_v17 = vpop.xlane.xlu1 %1924  ;;  %v2599_v1 = vrot.slane %v1931_v14, %v5145_v51 }
 0x27b   :  { %v2571_v8 = vsel %vm2254_vm14, %v2570_v40, %v2566_v11  ;;  %v2584_v12 = vrot.slane %v1925_v17, %v5125_v44 }
 0x27c   :  { %v2816_v7 = vsel %vm5763_vm15, %v2571_v8, %v2814_v36  ;;  %vm2817_vm15 = vcmask 1045509  }
 0x27d   :  { %v1941_v3 = vpop.xlane.xlu0 %1940 }
 0x27e   :  { %v1927_v42 = vpop.xlane.xlu1 %1926  ;;  %v2624_v54 = vrot.slane %v1941_v3, %v5211_v23 }
 0x27f   :  { %v2589_v43 = vrot.slane %v1927_v42, %v5128_v45 }
 0x281   :  { %v1943_v15 = vpop.xlane.xlu0 %1942 }
 0x282   :  { %v1923_v41 = vpop.xlane.xlu1 %1922  ;;  %v2629_v38 = vrot.slane %v1943_v15, %v5218_v35 }
 0x283   :  { %v2579_v58 = vrot.slane %v1923_v41, %v5142_v56 }
 0x285   :  { %v2580_v46 = vsel %vm2156_vm0, %v2579_v58, %v2575_v25  ;;  %v1937_v60 = vpop.xlane.xlu0 %1936 }
 0x286   :  { %v2585_v22 = vsel %vm2163_vm1, %v2584_v12, %v2580_v46  ;;  %v1949_v36 = vpop.xlane.xlu1 %1948  ;;  %v2614_v27 = vrot.slane %v1937_v60, %v5189_v5 }
 0x287   :  { %v2590_v20 = vsel %vm2170_vm2, %v2589_v43, %v2585_v22  ;;  %v2644_v16 = vrot.slane %v1949_v36, %v5263_v48 }
 0x288   :  { %v2595_v61 = vsel %vm2177_vm3, %v2594_v33, %v2590_v20 }
 0x289   :  { %v2600_v21 = vsel %vm2184_vm4, %v2599_v1, %v2595_v61  ;;  %v1939_v13 = vpop.xlane.xlu0 %1938 }
 0x28a   :  { %v2605_v29 = vsel %vm2191_vm5, %v2604_v32, %v2600_v21  ;;  %v1947_v47 = vpop.xlane.xlu1 %1946  ;;  %v2619_v18 = vrot.slane %v1939_v13, %v5201_v24 }
 0x28b   :  { %v2610_v2 = vsel %vm2198_vm6, %v2609_v6, %v2605_v29  ;;  %v2639_v26 = vrot.slane %v1947_v47, %v5256_v4 }
 0x28c   :  { %v2615_v39 = vsel %vm2205_vm7, %v2614_v27, %v2610_v2 }
 0x28d   :  { %v2620_v9 = vsel %vm2212_vm8, %v2619_v18, %v2615_v39  ;;  %v1951_v30 = vpop.xlane.xlu0 %1950 }
 0x28e   :  { %v2625_v34 = vsel %vm2219_vm9, %v2624_v54, %v2620_v9  ;;  %v1959_v49 = vpop.xlane.xlu1 %1958  ;;  %v2649_v40 = vrot.slane %v1951_v30, %v5267_v50 }
 0x28f   :  { %v2630_v52 = vsel %vm2226_vm10, %v2629_v38, %v2625_v34  ;;  %v2668_v29 = vrot.slane %v1959_v49, %v5128_v45 }
 0x291   :  { %v1945_v59 = vpop.xlane.xlu0 %1944 }
 0x292   :  { %v1955_v57 = vpop.xlane.xlu1 %1954  ;;  %v2634_v37 = vrot.slane %v1945_v59, %v5246_v28 }
 0x293   :  { %v2658_v20 = vrot.slane %v1955_v57, %v5142_v56 }
 0x294   :  { %v2635_v10 = vsel %vm2233_vm11, %v2634_v37, %v2630_v52 }
 0x295   :  { %v2640_v0 = vsel %vm2240_vm12, %v2639_v26, %v2635_v10  ;;  %v1957_v11 = vpop.xlane.xlu0 %1956 }
 0x296   :  { %v1965_v17 = vpop.xlane.xlu1 %1964  ;;  %v2645_v14 = vsel %vm2247_vm13, %v2644_v16, %v2640_v0  ;;  %v2663_v32 = vrot.slane %v1957_v11, %v5125_v44 }
 0x297   :  { %v2650_v8 = vsel %vm2254_vm14, %v2649_v40, %v2645_v14  ;;  %v2683_v49 = vrot.slane %v1965_v17, %v5179_v63 }
 0x298   :  { %v5560_v42 = vsel %vm2817_vm15, %v2650_v8, %v2816_v7 }
 0x299   :  { %v1953_v3 = vpop.xlane.xlu0 %1952 }
 0x29a   :  { %v1967_v41 = vpop.xlane.xlu1 %1966  ;;  %v2654_v60 = vrot.slane %v1953_v3, %v5134_v31 }
 0x29b   :  { %v2688_v40 = vrot.slane %v1967_v41, %v5183_v53 }
 0x29c   :  { %v2659_v7 = vsel %vm2156_vm0, %v2658_v20, %v2654_v60 }
 0x29d   :  { %v5562_v25 = vpop.xlane.xlu0 %1976  ;;  %v2664_v21 = vsel %vm2163_vm1, %v2663_v32, %v2659_v7 }
 0x29e   :  { %v1961_v15 = vpop.xlane.xlu1 %1960  ;;  %v2669_v2 = vsel %vm2170_vm2, %v2668_v29, %v2664_v21 }
 0x29f   :  { %v2673_v27 = vrot.slane %v1961_v15, %v5139_v55 }
 0x2a1   :  { %v5564_v12 = vpop.xlane.xlu0 %1978  ;;  %v2674_v54 = vsel %vm2177_vm3, %v2673_v27, %v2669_v2 }
 0x2a2   :  { %v1963_v58 = vpop.xlane.xlu1 %1962 }
 0x2a3   :  { %v2678_v18 = vrot.slane %v1963_v58, %v5145_v51 }
 0x2a5   :  { %v1989_v46 = vpop.xlane.xlu0 %1988  ;;  %v2679_v9 = vsel %vm2184_vm4, %v2678_v18, %v2674_v54 }
 0x2a6   :  { %v1973_v43 = vpop.xlane.xlu1 %1972  ;;  %v2742_v52 = vrot.slane %v1989_v46, %v5125_v44  ;;  %v2684_v37 = vsel %vm2191_vm5, %v2683_v49, %v2679_v9 }
 0x2a7   :  { %v2703_v41 = vrot.slane %v1973_v43, %v5211_v23  ;;  %v2713_v43 = vrot.slane %v5562_v25, %v5246_v28 }
 0x2a9   :  { %v1991_v22 = vpop.xlane.xlu0 %1990 }
 0x2aa   :  { %v1975_v33 = vpop.xlane.xlu1 %1974  ;;  %v2747_v59 = vrot.slane %v1991_v22, %v5128_v45  ;;  %v2689_v45 = vsel %vm2198_vm6, %v2688_v40, %v2684_v37  ;;  %v4484_v37 = vld [vmem:[#allocation8 + $0x28] sm:$0xff]   ;;  %v4486_v40 = vld [vmem:[#allocation8 + $0x18] sm:$0xff]  }
 0x2ab   :  { %v2708_v60 = vrot.slane %v1975_v33, %v5218_v35 }
 0x2ad   :  { %v1987_v1 = vpop.xlane.xlu0 %1986 }
 0x2ae   :  { %v1969_v36 = vpop.xlane.xlu1 %1968  ;;  %v2737_v34 = vrot.slane %v1987_v1, %v5142_v56 }
 0x2af   :  { %v2693_v26 = vrot.slane %v1969_v36, %v5189_v5 }
 0x2b1   :  { %v1997_v6 = vpop.xlane.xlu0 %1996  ;;  %v2694_v17 = vsel %vm2205_vm7, %v2693_v26, %v2689_v45 }
 0x2b2   :  { %v1971_v61 = vpop.xlane.xlu1 %1970 }
 0x2b3   :  { %v2698_v56 = vrot.slane %v1971_v61, %v5201_v24 }
 0x2b5   :  { %v1999_v47 = vpop.xlane.xlu0 %1998  ;;  %v2699_v3 = vsel %vm2212_vm8, %v2698_v56, %v2694_v17  ;;  %v4487_v56 = vld [vmem:[#allocation8 + $0x10] sm:$0xff]  }
 0x2b6   :  { %v5573_v13 = vpop.xlane.xlu1 %1980  ;;  %v2704_v46 = vsel %vm2219_vm9, %v2703_v41, %v2699_v3  ;;  %v2767_v20 = vrot.slane %v1999_v47, %v5183_v53  ;;  %v4491_v41 = vld [vmem:[#allocation8 + $0x70] sm:$0xff]  }
 0x2b7   :  { %v2709_v1 = vsel %vm2226_vm10, %v2708_v60, %v2704_v46  ;;  %v2723_v25 = vrot.slane %v5573_v13, %v5263_v48  ;;  %v4494_v46 = vld [vmem:[#allocation8 + $0x58] sm:$0xff]  }
 0x2b9   :  { %v1993_v38 = vpop.xlane.xlu0 %1992 }
 0x2ba   :  { %v1985_v39 = vpop.xlane.xlu1 %1984  ;;  %v2752_v44 = vrot.slane %v1993_v38, %v5139_v55  ;;  %v2762_v55 = vrot.slane %v1997_v6, %v5179_v63  ;;  %v2714_v6 = vsel %vm2233_vm11, %v2713_v43, %v2709_v1  ;;  %v4498_v1 = vld [vmem:[#allocation8 + $0xb8] sm:$0xff]   ;;  %v4499_v43 = vld [vmem:[#allocation8 + $0xb0] sm:$0xff]  }
 0x2bb   :  { %v2733_v30 = vrot.slane %v1985_v39, %v5134_v31 }
 0x2bd   :  { %v2738_v57 = vsel %vm2156_vm0, %v2737_v34, %v2733_v30  ;;  %v1995_v10 = vpop.xlane.xlu0 %1994  ;;  %vm2819_vm0 = vcmask 1046534  }
 0x2be   :  { %v2743_v16 = vsel %vm2163_vm1, %v2742_v52, %v2738_v57  ;;  %v1983_v0 = vpop.xlane.xlu1 %1982  ;;  %v2757_v11 = vrot.slane %v1995_v10, %v5145_v51  ;;  %vm2821_vm1 = vcmask 1047559   ;;  %v4836_v57 = vmov 0.0   ;;  %v4485_v10 = vld [vmem:[#allocation8 + $0x20] sm:$0xff]  }
 0x2bf   :  { %v2748_v31 = vsel %vm2170_vm2, %v2747_v59, %v2743_v16  ;;  %v2728_v2 = vrot.slane %v1983_v0, %v5267_v50  ;;  %vm2018_vm2 = vcmp.lt.s32.totalorder %v5098_v19, 10  ;;  %4237 = vmatprep.subr.bf16.mxu1 %v4836_v57  ;;  %v4489_v0 = vld [vmem:[#allocation8] sm:$0xff]  }
 0x2c0   :  { %v2753_v14 = vsel %vm2177_vm3, %v2752_v44, %v2748_v31  ;;  %vm4837_vm3 = vmmov 0   ;;  %v4488_v31 = vld [vmem:[#allocation8 + $0x8] sm:$0xff]  }
 0x2c1   :  { %v2005_v8 = vpop.xlane.xlu0 %2004  ;;  %v2758_v15 = vsel %vm2184_vm4, %v2757_v11, %v2753_v14  ;;  %4253 = vmatprep.mubr.msk.bf16.mxu1 %vm4837_vm3, %v4836_v57  ;;  %vm5764_vm4 = vcmask 1041409  }
 0x2c2   :  { %v2007_v58 = vpop.xlane.xlu1 %2006  ;;  %v2763_v51 = vsel %vm2191_vm5, %v2762_v55, %v2758_v15  ;;  %v2782_v33 = vrot.slane %v2005_v8, %v5211_v23  ;;  %v4490_v8 = vld [vmem:[#allocation8 + $0x78] sm:$0xff]   ;;  %v4492_v15 = vld [vmem:[#allocation8 + $0x68] sm:$0xff]   ;;  %v4495_v55 = vld [vmem:[#allocation8 + $0x50] sm:$0xff]   ;;  %vm5765_vm5 = vcmask 1042434  }
 0x2c3   :  { %v2768_v32 = vsel %vm2198_vm6, %v2767_v20, %v2763_v51  ;;  %v2787_v53 = vrot.slane %v2007_v58, %v5218_v35  ;;  %v4493_v58 = vld [vmem:[#allocation8 + $0x60] sm:$0xff]   ;;  %vm5766_vm6 = vcmask 1043459  }
 0x2c4   :  { %v4497_v51 = vld [vmem:[#allocation8 + $0x40] sm:$0xff]  }
 0x2c5   :  { %v2001_v22 = vpop.xlane.xlu0 %2000 }
 0x2c6   :  { %v2772_v36 = vrot.slane %v2001_v22, %v5189_v5  ;;  %v2009_v61 = vpop.xlane.xlu1 %2008  ;;  %v2718_v5 = vrot.slane %v5564_v12, %v5256_v4  ;;  %v4496_v22 = vld [vmem:[#allocation8 + $0x48] sm:$0xff]  }
 0x2c7   :  { %v2792_v23 = vrot.slane %v2009_v61, %v5246_v28  ;;  %v4502_v61 = vld [vmem:[#allocation8 + $0x98] sm:$0xff]  }
 0x2c8   :  { %v2773_v21 = vsel %vm2205_vm7, %v2772_v36, %v2768_v32  ;;  %v4501_v32 = vld [vmem:[#allocation8 + $0xa0] sm:$0xff]  }
 0x2c9   :  { %v2003_v7 = vpop.xlane.xlu0 %2002 }
 0x2ca   :  { %v2777_v63 = vrot.slane %v2003_v7, %v5201_v24  ;;  %v2719_v24 = vsel %vm2240_vm12, %v2718_v5, %v2714_v6  ;;  %v2015_v54 = vpop.xlane.xlu1 %2014  ;;  %v4500_v7 = vld [vmem:[#allocation8 + $0xa8] sm:$0xff]   ;;  %v4506_v5 = vld [vmem:[#allocation8 + $0xf8] sm:$0xff]  }
 0x2cb   :  { %v2724_v39 = vsel %vm2247_vm13, %v2723_v25, %v2719_v24  ;;  %v2807_v34 = vrot.slane %v2015_v54, %v5267_v50  ;;  %v4483_v50 = vld [vmem:[#allocation8 + $0x30] sm:$0xff]   ;;  %v4504_v6 = vld [vmem:[#allocation8 + $0x88] sm:$0xff]  }
 0x2cc   :  { %v2778_v29 = vsel %vm2212_vm8, %v2777_v63, %v2773_v21  ;;  %v2729_v13 = vsel %vm2254_vm14, %v2728_v2, %v2724_v39  ;;  %v4503_v63 = vld [vmem:[#allocation8 + $0x90] sm:$0xff]   ;;  %v4508_v25 = vld [vmem:[#allocation8 + $0xe8] sm:$0xff]  }
 0x2cd   :  { %v2783_v27 = vsel %vm2219_vm9, %v2782_v33, %v2778_v29  ;;  %v2011_v47 = vpop.xlane.xlu0 %2010  ;;  %v2820_v49 = vsel %vm2819_vm0, %v2729_v13, %v5560_v42  ;;  %v4505_v33 = vld [vmem:[#allocation8 + $0x80] sm:$0xff]   ;;  %v4507_v29 = vld [vmem:[#allocation8 + $0xf0] sm:$0xff]   ;;  %v4512_v2 = vld [vmem:[#allocation8 + $0xc8] sm:$0xff]  }
 0x2ce   :  { %v2788_v18 = vsel %vm2226_vm10, %v2787_v53, %v2783_v27  ;;  %v2797_v12 = vrot.slane %v2011_v47, %v5256_v4  ;;  %v4509_v27 = vld [vmem:[#allocation8 + $0xe0] sm:$0xff]   ;;  %v4510_v47 = vld [vmem:[#allocation8 + $0xd8] sm:$0xff]   ;;  %v4511_v24 = vld [vmem:[#allocation8 + $0xd0] sm:$0xff]  }
 0x2cf   :  { %v2793_v35 = vsel %vm2233_vm11, %v2792_v23, %v2788_v18  ;;  %v4513_v23 = vld [vmem:[#allocation8 + $0xc0] sm:$0xff]   ;;  %v4516_v39 = vld [vmem:[#allocation8 + $0x128] sm:$0xff]   ;;  %v4518_v13 = vld [vmem:[#allocation8 + $0x118] sm:$0xff]  }
 0x2d0   :  { %v2798_v30 = vsel %vm2240_vm12, %v2797_v12, %v2793_v35  ;;  %v4514_v12 = vld [vmem:[#allocation8 + $0x138] sm:$0xff]   ;;  %v4515_v35 = vld [vmem:[#allocation8 + $0x130] sm:$0xff]  }
 0x2d1   :  { %v2013_v38 = vpop.xlane.xlu0 %2012 }
 0x2d2   :  { %v2802_v9 = vrot.slane %v2013_v38, %v5263_v48  ;;  %v4482_v48 = vld [vmem:[#allocation8 + $0x38] sm:$0xff]   ;;  %v4517_v38 = vld [vmem:[#allocation8 + $0x120] sm:$0xff]  }
 0x2d3   :  { %4238 = vmatpush3.bf16.msra.mxu1 %v4482_v48  ;;  %v4523_v48 = vld [vmem:[#allocation8 + $0x170] sm:$0xff]  }
 0x2d4   :  { %v2803_v28 = vsel %vm2247_vm13, %v2802_v9, %v2798_v30  ;;  %4239 = vmatprep.subr.bf16.mxu1 %v4836_v57  ;;  %v4519_v9 = vld [vmem:[#allocation8 + $0x110] sm:$0xff]   ;;  %v4520_v30 = vld [vmem:[#allocation8 + $0x108] sm:$0xff]  }
 0x2d5   :  { %v2808_v4 = vsel %vm2254_vm14, %v2807_v34, %v2803_v28 }
 0x2d6   :  { %v2822_v52 = vsel %vm2821_vm1, %v2808_v4, %v2820_v49  ;;  %v4521_v4 = vld [vmem:[#allocation8 + $0x100] sm:$0xff]  }
 0x2d7   :  { %v2824_v59 = vsel %vm2018_vm2, %v2822_v52, -1e+30  ;;  %4240 = vmatpush3.bf16.msra.mxu1 %v4483_v50  ;;  %v4522_v52 = vld [vmem:[#allocation8 + $0x178] sm:$0xff]   ;;  %v4524_v50 = vld [vmem:[#allocation8 + $0x168] sm:$0xff]  }
 0x2d8   :  { %2825 = vmax.xlane.f32.xlu0 %v2824_v59  ;;  %4241 = vmatprep.subr.bf16.mxu1 %v4836_v57 }
 0x2db   :  { %4242 = vmatpush3.bf16.msra.mxu1 %v4484_v37  ;;  %v4525_v37 = vld [vmem:[#allocation8 + $0x160] sm:$0xff]  }
 0x2dc   :  { %4243 = vmatprep.subr.bf16.mxu1 %v4836_v57 }
 0x2df   :  { %4244 = vmatpush3.bf16.msra.mxu1 %v4485_v10  ;;  %v4529_v10 = vld [vmem:[#allocation8 + $0x140] sm:$0xff]  }
 0x2e0   :  { %4245 = vmatprep.subr.bf16.mxu1 %v4836_v57 }
 0x2e3   :  { %4246 = vmatpush3.bf16.msra.mxu1 %v4486_v40 }
 0x2e4   :  { %4247 = vmatprep.subr.bf16.mxu1 %v4836_v57 }
 0x2e7   :  { %4248 = vmatpush3.bf16.msra.mxu1 %v4487_v56  ;;  %v4530_v56 = vld [vmem:[#allocation8 + $0x1b8] sm:$0xff]  }
 0x2e8   :  { %4249 = vmatprep.subr.bf16.mxu1 %v4836_v57 }
 0x2eb   :  { %4250 = vmatpush3.bf16.msra.mxu1 %v4488_v31 }
 0x2ec   :  { %4251 = vmatprep.subr.bf16.mxu1 %v4836_v57 }
 0x2ef   :  { %4252 = vmatpush3.bf16.msra.mxu1 %v4489_v0  ;;  %v4531_v0 = vld [vmem:[#allocation8 + $0x1b0] sm:$0xff]  }
 0x2f0   :  { %4257 = vmatprep.subr.bf16.mxu1 %v4836_v57 }
 0x361   :  { %v2826_v19 = vpop.xlane.xlu0 %2825 }
 0x362   :  { %v2827_v42 = vsub.f32 %v2824_v59, %v2826_v19  ;;  %v4526_v19 = vld [vmem:[#allocation8 + $0x158] sm:$0xff]  }
 0x364   :  { %v2828_v26 = vmul.f32 1.442695, %v2827_v42  ;;  %v4527_v42 = vld [vmem:[#allocation8 + $0x150] sm:$0xff]  }
 0x366   :  { %4674 = vpow2.f32 %v2828_v26  ;;  %v4528_v26 = vld [vmem:[#allocation8 + $0x148] sm:$0xff]  }
 0x373   :  { %v4675_v16 = vpop.eup %4674 }
 0x374   :  { %2830 = vadd.xlane.f32.xlu1 %v4675_v16 }
 0x3fd   :  { %v2831_v44 = vpop.xlane.xlu1 %2830 }
 0x3fe   :  { %4676 = vrcp.f32 %v2831_v44  ;;  %v4532_v44 = vld [vmem:[#allocation8 + $0x1a8] sm:$0xff]  }
 0x40b   :  { %v4677_v45 = vpop.eup %4676 }
 0x40c   :  { %v5648_v11 = vmul.f32 %v4677_v45, %v4675_v16  ;;  %v4533_v45 = vld [vmem:[#allocation8 + $0x1a0] sm:$0xff]  }
 0x40e   :  { %v2842_v17 = vrot.slane %v5648_v11, %v4908_v62  ;;  %3781 = vst [vmem:[#allocation12] sm:$0xff] %v5648_v11  ;;  %v2835_v34 = vcombine.high %v5648_v11, %v5648_v11  ;;  %v4535_v11 = vld [vmem:[#allocation8 + $0x190] sm:$0xff]  }
 0x410   :  { %v2858_v14 = vrot.slane %v2842_v17, %v4908_v62  ;;  %v2850_v60 = vcombine.high %v2842_v17, %v2842_v17  ;;  %v2849_v28 = vrot.slane %v2835_v34, %v4908_v62  ;;  %v4536_v17 = vld [vmem:[#allocation8 + $0x188] sm:$0xff]  }
 0x412   :  { %v2892_v3 = vpack.c.bf16 %v2858_v14, %v2858_v14  ;;  %v2872_v36 = vrot.slane %v2850_v60, %v4908_v62  ;;  %v2880_v21 = vcombine.high %v2858_v14, %v2858_v14  ;;  %v2865_v49 = vrot.slane %v2849_v28, %v4908_v62  ;;  %v4537_v14 = vld [vmem:[#allocation8 + $0x180] sm:$0xff]  }
 0x413   :  { %v2851_v16 = vcombine.high %v2849_v28, %v2849_v28 }
 0x414   :  { %4254 = vmatmul.mubr.bf16.vlgmr.msra.gmra.mxu1 %v2892_v3  ;;  %v2893_v20 = vpack.c.bf16 %v2872_v36, %v2872_v36  ;;  %v2894_v53 = vpack.c.bf16 %v2880_v21, %v2880_v21  ;;  %v2882_v18 = vcombine.high %v2872_v36, %v2872_v36  ;;  %v2896_v59 = vpack.c.bf16 %v2865_v49, %v2865_v49  ;;  %v4538_v3 = vld [vmem:[#allocation8 + $0x1f8] sm:$0xff]  }
 0x415   :  { %4258 = vmatpush3.bf16.msra.mxu1 %v4490_v8  ;;  %4273 = vmatprep.mubr.msk.bf16.mxu1 %vm4837_vm3, %v4836_v57  ;;  %v2879_v40 = vrot.slane %v2851_v16, %v4908_v62  ;;  %v4534_v62 = vld [vmem:[#allocation8 + $0x198] sm:$0xff]   ;;  %v2881_v8 = vcombine.high %v2865_v49, %v2865_v49 }
 0x416   :  { %4259 = vmatprep.subr.bf16.mxu1 %v4836_v57  ;;  %v2895_v54 = vpack.c.bf16 %v2882_v18, %v2882_v18  ;;  %v4542_v36 = vld [vmem:[#allocation8 + $0x1d8] sm:$0xff]  }
 0x417   :  { %v2897_v31 = vpack.c.bf16 %v2879_v40, %v2879_v40 }
 0x419   :  { %4260 = vmatpush3.bf16.msra.mxu1 %v4491_v41  ;;  %v2898_v41 = vpack.c.bf16 %v2881_v8, %v2881_v8 }
 0x41a   :  { %4261 = vmatprep.subr.bf16.mxu1 %v4836_v57 }
 0x41d   :  { %4262 = vmatpush3.bf16.msra.mxu1 %v4492_v15 }
 0x41e   :  { %4263 = vmatprep.subr.bf16.mxu1 %v4836_v57 }
 0x421   :  { %4264 = vmatpush3.bf16.msra.mxu1 %v4493_v58  ;;  %v4539_v58 = vld [vmem:[#allocation8 + $0x1f0] sm:$0xff]  }
 0x422   :  { %4265 = vmatprep.subr.bf16.mxu1 %v4836_v57 }
 0x425   :  { %4266 = vmatpush3.bf16.msra.mxu1 %v4494_v46 }
 0x426   :  { %4267 = vmatprep.subr.bf16.mxu1 %v4836_v57 }
 0x429   :  { %4268 = vmatpush3.bf16.msra.mxu1 %v4495_v55 }
 0x42a   :  { %4269 = vmatprep.subr.bf16.mxu1 %v4836_v57 }
 0x42d   :  { %4270 = vmatpush3.bf16.msra.mxu1 %v4496_v22  ;;  %v4540_v22 = vld [vmem:[#allocation8 + $0x1e8] sm:$0xff]  }
 0x42e   :  { %4271 = vmatprep.subr.bf16.mxu1 %v4836_v57 }
 0x431   :  { %4272 = vmatpush3.bf16.msra.mxu1 %v4497_v51  ;;  %v4541_v51 = vld [vmem:[#allocation8 + $0x1e0] sm:$0xff]  }
 0x432   :  { %4277 = vmatprep.subr.bf16.mxu1 %v4836_v57 }
 0x434   :  { %4274 = vmatmul.mubr.bf16.vlgmr.msra.gmra.mxu1 %v2893_v20  ;;  %v4544_v20 = vld [vmem:[#allocation8 + $0x1c8] sm:$0xff]  }
 0x435   :  { %4278 = vmatpush3.bf16.msra.mxu1 %v4498_v1  ;;  %4293 = vmatprep.mubr.msk.bf16.mxu1 %vm4837_vm3, %v4836_v57  ;;  %v4543_v1 = vld [vmem:[#allocation8 + $0x1d0] sm:$0xff]  }
 0x436   :  { %4279 = vmatprep.subr.bf16.mxu1 %v4836_v57 }
 0x439   :  { %4280 = vmatpush3.bf16.msra.mxu1 %v4499_v43  ;;  %v4545_v43 = vld [vmem:[#allocation8 + $0x1c0] sm:$0xff]  }
 0x43a   :  { %4281 = vmatprep.subr.bf16.mxu1 %v4836_v57 }
 0x43d   :  { %4282 = vmatpush3.bf16.msra.mxu1 %v4500_v7  ;;  %v2883_v7 = vcombine.high %v2879_v40, %v2879_v40 }
 0x43e   :  { %4283 = vmatprep.subr.bf16.mxu1 %v4836_v57 }
 0x441   :  { %4284 = vmatpush3.bf16.msra.mxu1 %v4501_v32  ;;  %v5729_v32 = vld [vmem:[#allocation2] sm:$0xff] }
 0x442   :  { %4285 = vmatprep.subr.bf16.mxu1 %v4836_v57 }
 0x445   :  { %4286 = vmatpush3.bf16.msra.mxu1 %v4502_v61  ;;  %v3734_v61 = vrot.slane %v5729_v32, 1 }
 0x446   :  { %4287 = vmatprep.subr.bf16.mxu1 %v4836_v57 }
 0x449   :  { %4288 = vmatpush3.bf16.msra.mxu1 %v4503_v63  ;;  %v2899_v63 = vpack.c.bf16 %v2883_v7, %v2883_v7 }
 0x44a   :  { %4289 = vmatprep.subr.bf16.mxu1 %v4836_v57 }
 0x44d   :  { %4290 = vmatpush3.bf16.msra.mxu1 %v4504_v6 }
 0x44e   :  { %4291 = vmatprep.subr.bf16.mxu1 %v4836_v57 }
 0x451   :  { %4292 = vmatpush3.bf16.msra.mxu1 %v4505_v33 }
 0x452   :  { %4297 = vmatprep.subr.bf16.mxu1 %v4836_v57 }
 0x454   :  { %4294 = vmatmul.mubr.bf16.vlgmr.msra.gmra.mxu1 %v2894_v53 }
 0x455   :  { %4298 = vmatpush3.bf16.msra.mxu1 %v4506_v5  ;;  %4313 = vmatprep.mubr.msk.bf16.mxu1 %vm4837_vm3, %v4836_v57 }
 0x456   :  { %4299 = vmatprep.subr.bf16.mxu1 %v4836_v57 }
 0x459   :  { %4300 = vmatpush3.bf16.msra.mxu1 %v4507_v29 }
 0x45a   :  { %4301 = vmatprep.subr.bf16.mxu1 %v4836_v57 }
 0x45d   :  { %4302 = vmatpush3.bf16.msra.mxu1 %v4508_v25 }
 0x45e   :  { %4303 = vmatprep.subr.bf16.mxu1 %v4836_v57 }
 0x461   :  { %4304 = vmatpush3.bf16.msra.mxu1 %v4509_v27 }
 0x462   :  { %4305 = vmatprep.subr.bf16.mxu1 %v4836_v57 }
 0x465   :  { %4306 = vmatpush3.bf16.msra.mxu1 %v4510_v47 }
 0x466   :  { %4307 = vmatprep.subr.bf16.mxu1 %v4836_v57 }
 0x469   :  { %4308 = vmatpush3.bf16.msra.mxu1 %v4511_v24 }
 0x46a   :  { %4309 = vmatprep.subr.bf16.mxu1 %v4836_v57 }
 0x46d   :  { %4310 = vmatpush3.bf16.msra.mxu1 %v4512_v2 }
 0x46e   :  { %4311 = vmatprep.subr.bf16.mxu1 %v4836_v57 }
 0x471   :  { %4312 = vmatpush3.bf16.msra.mxu1 %v4513_v23 }
 0x472   :  { %4317 = vmatprep.subr.bf16.mxu1 %v4836_v57 }
 0x474   :  { %4314 = vmatmul.mubr.bf16.vlgmr.msra.gmra.mxu1 %v2895_v54 }
 0x475   :  { %4318 = vmatpush3.bf16.msra.mxu1 %v4514_v12  ;;  %4333 = vmatprep.mubr.msk.bf16.mxu1 %vm4837_vm3, %v4836_v57 }
 0x476   :  { %4319 = vmatprep.subr.bf16.mxu1 %v4836_v57 }
 0x479   :  { %4320 = vmatpush3.bf16.msra.mxu1 %v4515_v35  ;;  %v3736_v35 = vrot.slane %v5729_v32, 3 }
 0x47a   :  { %4321 = vmatprep.subr.bf16.mxu1 %v4836_v57 }
 0x47d   :  { %4322 = vmatpush3.bf16.msra.mxu1 %v4516_v39 }
 0x47e   :  { %4323 = vmatprep.subr.bf16.mxu1 %v4836_v57 }
 0x481   :  { %4324 = vmatpush3.bf16.msra.mxu1 %v4517_v38 }
 0x482   :  { %4325 = vmatprep.subr.bf16.mxu1 %v4836_v57 }
 0x485   :  { %4326 = vmatpush3.bf16.msra.mxu1 %v4518_v13 }
 0x486   :  { %4327 = vmatprep.subr.bf16.mxu1 %v4836_v57 }
 0x489   :  { %4328 = vmatpush3.bf16.msra.mxu1 %v4519_v9 }
 0x48a   :  { %4329 = vmatprep.subr.bf16.mxu1 %v4836_v57 }
 0x48d   :  { %4330 = vmatpush3.bf16.msra.mxu1 %v4520_v30 }
 0x48e   :  { %4331 = vmatprep.subr.bf16.mxu1 %v4836_v57 }
 0x491   :  { %4332 = vmatpush3.bf16.msra.mxu1 %v4521_v4 }
 0x492   :  { %4337 = vmatprep.subr.bf16.mxu1 %v4836_v57 }
 0x494   :  { %4334 = vmatmul.mubr.bf16.vlgmr.msra.gmra.mxu1 %v2896_v59 }
 0x495   :  { %4338 = vmatpush3.bf16.msra.mxu1 %v4522_v52  ;;  %4353 = vmatprep.mubr.msk.bf16.mxu1 %vm4837_vm3, %v4836_v57 }
 0x496   :  { %4339 = vmatprep.subr.bf16.mxu1 %v4836_v57 }
 0x499   :  { %4340 = vmatpush3.bf16.msra.mxu1 %v4523_v48 }
 0x49a   :  { %4341 = vmatprep.subr.bf16.mxu1 %v4836_v57 }
 0x49d   :  { %4342 = vmatpush3.bf16.msra.mxu1 %v4524_v50 }
 0x49e   :  { %4343 = vmatprep.subr.bf16.mxu1 %v4836_v57 }
 0x4a1   :  { %4344 = vmatpush3.bf16.msra.mxu1 %v4525_v37 }
 0x4a2   :  { %4345 = vmatprep.subr.bf16.mxu1 %v4836_v57 }
 0x4a5   :  { %4346 = vmatpush3.bf16.msra.mxu1 %v4526_v19 }
 0x4a6   :  { %4347 = vmatprep.subr.bf16.mxu1 %v4836_v57 }
 0x4a9   :  { %4348 = vmatpush3.bf16.msra.mxu1 %v4527_v42 }
 0x4aa   :  { %4349 = vmatprep.subr.bf16.mxu1 %v4836_v57 }
 0x4ad   :  { %4350 = vmatpush3.bf16.msra.mxu1 %v4528_v26 }
 0x4ae   :  { %4351 = vmatprep.subr.bf16.mxu1 %v4836_v57 }
 0x4b1   :  { %4352 = vmatpush3.bf16.msra.mxu1 %v4529_v10 }
 0x4b2   :  { %4357 = vmatprep.subr.bf16.mxu1 %v4836_v57 }
 0x4b4   :  { %4354 = vmatmul.mubr.bf16.vlgmr.msra.gmra.mxu1 %v2897_v31 }
 0x4b5   :  { %4358 = vmatpush3.bf16.msra.mxu1 %v4530_v56  ;;  %4373 = vmatprep.mubr.msk.bf16.mxu1 %vm4837_vm3, %v4836_v57 }
 0x4b6   :  { %4359 = vmatprep.subr.bf16.mxu1 %v4836_v57 }
 0x4b9   :  { %4360 = vmatpush3.bf16.msra.mxu1 %v4531_v0 }
 0x4ba   :  { %4361 = vmatprep.subr.bf16.mxu1 %v4836_v57 }
 0x4bd   :  { %4362 = vmatpush3.bf16.msra.mxu1 %v4532_v44 }
 0x4be   :  { %4363 = vmatprep.subr.bf16.mxu1 %v4836_v57 }
 0x4c1   :  { %4364 = vmatpush3.bf16.msra.mxu1 %v4533_v45 }
 0x4c2   :  { %4365 = vmatprep.subr.bf16.mxu1 %v4836_v57 }
 0x4c5   :  { %4366 = vmatpush3.bf16.msra.mxu1 %v4534_v62 }
 0x4c6   :  { %4367 = vmatprep.subr.bf16.mxu1 %v4836_v57 }
 0x4c9   :  { %4368 = vmatpush3.bf16.msra.mxu1 %v4535_v11 }
 0x4ca   :  { %4369 = vmatprep.subr.bf16.mxu1 %v4836_v57 }
 0x4cd   :  { %4370 = vmatpush3.bf16.msra.mxu1 %v4536_v17 }
 0x4ce   :  { %4371 = vmatprep.subr.bf16.mxu1 %v4836_v57 }
 0x4d1   :  { %4372 = vmatpush3.bf16.msra.mxu1 %v4537_v14 }
 0x4d2   :  { %4377 = vmatprep.subr.bf16.mxu1 %v4836_v57 }
 0x4d4   :  { %4374 = vmatmul.mubr.bf16.vlgmr.msra.gmra.mxu1 %v2898_v41  ;;  %v3110_v15 = vpop.f32.mrf.mxu1 }
 0x4d5   :  { %4378 = vmatpush3.bf16.msra.mxu1 %v4538_v3  ;;  %4393 = vmatprep.mubr.msk.bf16.mxu1 %vm4837_vm3, %v4836_v57  ;;  %v3749_v5 = vadd.f32 %v5729_v32, %v3110_v15 }
 0x4d6   :  { %v4255_v46 = vpop.f32.mrf.mxu1  ;;  %4379 = vmatprep.subr.bf16.mxu1 %v4836_v57 }
 0x4d8   :  { %v3113_v55 = vpop.f32.mrf.mxu1 }
 0x4d9   :  { %4380 = vmatpush3.bf16.msra.mxu1 %v4539_v58 }
 0x4da   :  { %v4256_v60 = vpop.f32.mrf.mxu1  ;;  %4381 = vmatprep.subr.bf16.mxu1 %v4836_v57 }
 0x4dd   :  { %4382 = vmatpush3.bf16.msra.mxu1 %v4540_v22 }
 0x4de   :  { %4383 = vmatprep.subr.bf16.mxu1 %v4836_v57 }
 0x4e1   :  { %4384 = vmatpush3.bf16.msra.mxu1 %v4541_v51 }
 0x4e2   :  { %4385 = vmatprep.subr.bf16.mxu1 %v4836_v57 }
 0x4e5   :  { %4386 = vmatpush3.bf16.msra.mxu1 %v4542_v36 }
 0x4e6   :  { %4387 = vmatprep.subr.bf16.mxu1 %v4836_v57 }
 0x4e9   :  { %4388 = vmatpush3.bf16.msra.mxu1 %v4543_v1 }
 0x4ea   :  { %4389 = vmatprep.subr.bf16.mxu1 %v4836_v57 }
 0x4ed   :  { %4390 = vmatpush3.bf16.msra.mxu1 %v4544_v20 }
 0x4ee   :  { %4391 = vmatprep.subr.bf16.mxu1 %v4836_v57  ;;  %v3735_v57 = vrot.slane %v5729_v32, 2 }
 0x4f1   :  { %4392 = vmatpush3.bf16.msra.mxu1 %v4545_v43 }
 0x4f4   :  { %v3198_v6 = vpop.f32.mrf.mxu1  ;;  %4394 = vmatmul.mubr.bf16.vlgmr.msra.gmra.mxu1 %v2899_v63 }
 0x4f5   :  { %v3750_v33 = vadd.f32 %v3734_v61, %v3198_v6 }
 0x4f6   :  { %v4275_v21 = vpop.f32.mrf.mxu1 }
 0x4f7   :  { %v3765_v53 = vrot.slane %v3750_v33, 7 }
 0x4f8   :  { %v3201_v29 = vpop.f32.mrf.mxu1 }
 0x4f9   :  { %v3766_v25 = vsel %vm5764_vm4, %v3765_v53, %v3749_v5 }
 0x4fa   :  { %v4276_v27 = vpop.f32.mrf.mxu1 }
 0x514   :  { %v3286_v47 = vpop.f32.mrf.mxu1 }
 0x515   :  { %v3751_v24 = vadd.f32 %v3735_v57, %v3286_v47 }
 0x516   :  { %v4295_v2 = vpop.f32.mrf.mxu1 }
 0x517   :  { %v3767_v23 = vrot.slane %v3751_v24, 6 }
 0x518   :  { %v3289_v18 = vpop.f32.mrf.mxu1 }
 0x519   :  { %v3768_v12 = vsel %vm5765_vm5, %v3767_v23, %v3766_v25 }
 0x51a   :  { %v4296_v54 = vpop.f32.mrf.mxu1 }
 0x534   :  { %v3374_v39 = vpop.f32.mrf.mxu1 }
 0x535   :  { %v3752_v38 = vadd.f32 %v3736_v35, %v3374_v39 }
 0x536   :  { %v4315_v13 = vpop.f32.mrf.mxu1 }
 0x537   :  { %v3769_v9 = vrot.slane %v3752_v38, 5 }
 0x538   :  { %v3377_v34 = vpop.f32.mrf.mxu1 }
 0x539   :  { %v3770_v30 = vsel %vm5766_vm6, %v3769_v9, %v3768_v12 }
 0x53a   :  { %v4316_v28 = vpop.f32.mrf.mxu1 }
 0x53b   :  { %4789 = shalt.err (!%p4786_p1)
}
 0x53c   :  { %3801 = dma.vmem_to_hbm [thread:$0]  %s3799_s25, 128, %s5759_s7, [#allocation13]   ;;  %v3737_v4 = vrot.slane %v5729_v32, 4  ;;  %vm5767_vm7 = vcmask 1044484   ;;  %v3738_v44 = vrot.slane %v5729_v32, 5  ;;  %v3739_v45 = vrot.slane %v5729_v32, 6 }
 0x53d   :  { %v3740_v17 = vrot.slane %v5729_v32, 7  ;;  %s4839_s7 = smov [#allocation11]  }
 0x53e   :  { %s3788_s29 = sshll.u32 %s4839_s7, 4  ;;  %s3789_s29 = int_to_ptr.vmem [resolvable:$true] %s3788_s29 }
 0x53f   :  { %s4798_s30 = scalar_lea.vmem %s3789_s29, 128  ;;  %p4803_p3 = scmp.lt.s32.totalorder %s3789_s29, %s3789_s29 }
 0x540   :  { %p4799_p2 = scmp.ne.s32.totalorder %s3789_s29, %s4798_s30  ;;  %p4804_p4 = scmp.lt.s32.totalorder %s4798_s30, %s4798_s30 }
 0x542   :  { %p4805_p5 = por %p4804_p4, %p4803_p3 }
 0x544   :  { %p4806_p6 = pnand %p4805_p5, %p4799_p2 }
 0x554   :  { %v3462_v49 = vpop.f32.mrf.mxu1 }
 0x555   :  { %v3753_v52 = vadd.f32 %v3737_v4, %v3462_v49 }
 0x556   :  { %v4335_v59 = vpop.f32.mrf.mxu1 }
 0x557   :  { %v3771_v48 = vrot.slane %v3753_v52, 4 }
 0x558   :  { %v3465_v50 = vpop.f32.mrf.mxu1 }
 0x559   :  { %v3772_v37 = vsel %vm5767_vm7, %v3771_v48, %v3770_v30 }
 0x55a   :  { %v4336_v19 = vpop.f32.mrf.mxu1 }
 0x574   :  { %v3550_v42 = vpop.f32.mrf.mxu1 }
 0x575   :  { %v3754_v62 = vadd.f32 %v3738_v44, %v3550_v42 }
 0x576   :  { %v4355_v26 = vpop.f32.mrf.mxu1 }
 0x577   :  { %v3773_v14 = vrot.slane %v3754_v62, 3 }
 0x578   :  { %v3553_v16 = vpop.f32.mrf.mxu1 }
 0x579   :  { %v3774_v58 = vsel %vm2817_vm15, %v3773_v14, %v3772_v37 }
 0x57a   :  { %v4356_v10 = vpop.f32.mrf.mxu1 }
 0x594   :  { %v3638_v40 = vpop.f32.mrf.mxu1 }
 0x595   :  { %v3755_v11 = vadd.f32 %v3739_v45, %v3638_v40 }
 0x596   :  { %v4375_v56 = vpop.f32.mrf.mxu1 }
 0x597   :  { %v3775_v8 = vrot.slane %v3755_v11, 2 }
 0x598   :  { %v3641_v31 = vpop.f32.mrf.mxu1 }
 0x599   :  { %v3776_v22 = vsel %vm2819_vm0, %v3775_v8, %v3774_v58 }
 0x59a   :  { %v4376_v0 = vpop.f32.mrf.mxu1 }
 0x5b4   :  { %v3726_v3 = vpop.f32.mrf.mxu1 }
 0x5b5   :  { %v3756_v41 = vadd.f32 %v3740_v17, %v3726_v3 }
 0x5b6   :  { %v4395_v15 = vpop.f32.mrf.mxu1 }
 0x5b7   :  { %v3777_v46 = vrot.slane %v3756_v41, 1 }
 0x5b8   :  { %v3729_v55 = vpop.f32.mrf.mxu1 }
 0x5b9   :  { %v3778_v60 = vsel %vm2821_vm1, %v3777_v46, %v3776_v22 }
 0x5ba   :  { %v4396_v51 = vpop.f32.mrf.mxu1  ;;  %3780 = vst [vmem:[#allocation11] sm:$0xff] %v3778_v60 }
 0x5bb   :  { %4809 = shalt.err (!%p4806_p6)
}
 0x5bc   :  { %3791 = dma.vmem_to_hbm [thread:$0]  %s3789_s29, 128, %s5758_s6, [#allocation4]  }
 0x5bd   :  { %4824 = dma.done.wait [#allocation4], 128  }
 0x5be   :  { %4825 = vsyncadd [#allocation4], 4294967168 }
 0x5bf   :  { %4826 = dma.done.wait [#allocation13], 128  }
 0x5c0   :  { %4827 = vsyncadd [#allocation13], 4294967168 }
 0x5c1   :  { %3808 = vsyncpa [#allocation3], 1 }
 0x5c2   :  { %3809 = vsyncpa [#allocation6], 1 }
 0x5c3   :  { %3810 = vsyncpa [#allocation9], 1 }
 0x5c4   :  { %3811 = vsyncpa [#allocation4], 1 }
 0x5c5   :  { %3812 = vsyncpa [#allocation13], 1 }

</bundles_post_ra>
